<compile_context>
chip_gen: v7x
topology: tpu7x:2x2x1
jax: 0.10.0
libtpu: 0.0.40
codegen_flags: <defaults>
</compile_context>

<pallas_src>
import numpy as np
import jax
import jax.numpy as jnp
from jax.experimental import pallas as pl
from jax.experimental.pallas import tpu as pltpu

MC_SAMPLES = 50


# ----------------------------- Pallas kernel --------------------------------

def _autoencoder_kernel(x_ref, eps_ref, sel_ref, we_ref, be_ref, wd_ref, bd_ref,
                        em_ref, ev_ref, z_ref, xp_ref):
    D, B = x_ref.shape            # (data_size, batch), feature-major
    E, SBp = eps_ref.shape        # (encoded_size, padded sample columns)
    Dout = xp_ref.shape[0]        # data_size
    n_enc = we_ref.shape[0]
    n_dec = wd_ref.shape[0]

    # ---- fused encoder (mean & var stacks block-diag fused), feature-major ----
    # First layer: contract against a static lane-slice of the padded weight so
    # x needs no host-side zero padding.
    h = jnp.dot(we_ref[0][:, :D], x_ref[...],
                preferred_element_type=jnp.float32) + be_ref[0]
    h = jnp.maximum(h, 0.0)                                   # Linear+foldedBN+ReLU
    for i in range(1, n_enc - 1):
        h = jnp.dot(we_ref[i], h, preferred_element_type=jnp.float32) + be_ref[i]
        h = jnp.maximum(h, 0.0)
    h = jnp.dot(we_ref[n_enc - 1], h,
                preferred_element_type=jnp.float32) + be_ref[n_enc - 1]

    em_t = h[:E, :]                                           # (E, B) encoder_mean
    ev_t = 0.05 + jax.nn.sigmoid(h[E:2 * E, :])               # (E, B) 0.05 + encoder_var
    em_ref[...] = em_t
    ev_ref[...] = ev_t

    # ---- reparameterization: ONE fused replication matmul for mean & std ----
    # column c = s*B + b  ->  sel[b, c] = 1 (precomputed on host, zero for pad cols)
    stats = jnp.concatenate([em_t, jnp.sqrt(ev_t)], axis=0)   # (2E, B)
    rep = jnp.dot(stats, sel_ref[...],
                  preferred_element_type=jnp.float32)          # (2E, SBp)
    z_t = rep[:E, :] + rep[E:2 * E, :] * eps_ref[...]          # (E, SBp), lane-dense
    z_ref[...] = z_t                                           # single store; z stays live

    # ---- decoder_mean over all sample columns (samples on lanes) ----
    # First layer: static lane-slice of the padded weight instead of
    # concatenating zero rows onto z (no extra VMEM buffer).
    h = jnp.dot(wd_ref[0][:, :E], z_t,
                preferred_element_type=jnp.float32) + bd_ref[0]
    h = jnp.maximum(h, 0.0)
    for i in range(1, n_dec - 1):
        h = jnp.dot(wd_ref[i], h, preferred_element_type=jnp.float32) + bd_ref[i]
        h = jnp.maximum(h, 0.0)
    h = jnp.dot(wd_ref[n_dec - 1], h,
                preferred_element_type=jnp.float32) + bd_ref[n_dec - 1]
    xp_ref[...] = jax.nn.sigmoid(h[:Dout, :])                  # (D, SBp), full-lane stores


def autoencoder_forward(x_fm, eps, sel, w_enc, b_enc, w_dec, b_dec):
    """Single gridless Pallas invocation.

    x_fm : (D, B)       feature-major input (pass x.T if data is batch-major)
    eps  : (E, SB_pad)  iid N(0,1) draws, sample columns lane-dense
    sel  : (B, SB_pad)  0/1 column replicator (see make_selector)
    Returns kernel-native layouts (no wrapper transposes/reshapes):
      em, ev : (E, B);  z : (E, SB_pad);  x_pred : (D, SB_pad)
    Only the first S*B columns of z / x_pred are valid samples.
    """
    D, B = x_fm.shape
    E, SBp = eps.shape
    vmem = pl.BlockSpec(memory_space=pltpu.MemorySpace.VMEM)
    em, ev, z, xp = pl.pallas_call(
        _autoencoder_kernel,
        out_shape=(
            jax.ShapeDtypeStruct((E, B), jnp.float32),    # em
            jax.ShapeDtypeStruct((E, B), jnp.float32),    # ev
            jax.ShapeDtypeStruct((E, SBp), jnp.float32),  # z       (lane-dense)
            jax.ShapeDtypeStruct((D, SBp), jnp.float32),  # x_pred  (lane-dense)
        ),
        in_specs=[vmem] * 7,
        out_specs=(vmem, vmem, vmem, vmem),
    )(x_fm, eps, sel, w_enc, b_enc, w_dec, b_dec)
    return {"em": em, "ev": ev, "z": z, "x_pred": xp, "mc_samples": MC_SAMPLES}


# ---------------- deterministic parameter construction (plain-JAX glue) -----

def _init_linear(key, fan_in, fan_out):
    kw, kb = jax.random.split(key)
    bound = 1.0 / jnp.sqrt(jnp.float32(fan_in))
    w = jax.random.uniform(kw, (fan_in, fan_out), jnp.float32, -bound, bound)
    b = jax.random.uniform(kb, (fan_out,), jnp.float32, -bound, bound)
    return w, b


def _init_bn(key, n):
    kg, kb, km, kv = jax.random.split(key, 4)
    gamma = 1.0 + 0.1 * jax.random.normal(kg, (n,), jnp.float32)
    beta = 0.1 * jax.random.normal(kb, (n,), jnp.float32)
    mean = 0.1 * jax.random.normal(km, (n,), jnp.float32)
    var = 1.0 + 0.1 * jax.random.uniform(kv, (n,), jnp.float32)
    return gamma, beta, mean, var


def build_stack(key, dims):
    """Linear layers along `dims`; eval-mode BatchNorm folded into first 4."""
    ws, bs = [], []
    keys = jax.random.split(key, len(dims) - 1)
    for i in range(len(dims) - 1):
        k_lin, k_bn = jax.random.split(keys[i])
        w, b = _init_linear(k_lin, dims[i], dims[i + 1])
        if i < 4:  # BN after the first 4 Linear layers of each stack
            gamma, beta, mean, var = _init_bn(k_bn, dims[i + 1])
            g = gamma / jnp.sqrt(var + 1e-5)
            w = w * g[None, :]
            b = b * g + (beta - mean * g)
        ws.append(w)
        bs.append(b)
    return ws, bs


def pack_fused_encoder(mean_ws, mean_bs, var_ws, var_bs, pad):
    """Block-diag fuse mean/var stacks, transpose to (out, in), zero-pad to (pad, pad)."""
    w_pack, b_pack = [], []
    for i in range(len(mean_ws)):
        wm, wv = mean_ws[i], var_ws[i]                   # (in, out)
        if i == 0:  # both stacks read the same input x
            w = jnp.concatenate([wm, wv], axis=1)        # (in, out_m + out_v)
        else:
            zmv = jnp.zeros((wm.shape[0], wv.shape[1]), jnp.float32)
            zvm = jnp.zeros((wv.shape[0], wm.shape[1]), jnp.float32)
            w = jnp.block([[wm, zmv], [zvm, wv]])        # block-diagonal
        b = jnp.concatenate([mean_bs[i], var_bs[i]])
        wt = w.T                                         # (out, in)
        wt = jnp.pad(wt, ((0, pad - wt.shape[0]), (0, pad - wt.shape[1])))
        bp = jnp.pad(b, (0, pad - b.shape[0]))
        w_pack.append(wt)
        b_pack.append(bp[:, None])
    return jnp.stack(w_pack), jnp.stack(b_pack)          # (5, pad, pad), (5, pad, 1)


def pack_decoder(ws, bs, pad):
    """Transpose decoder weights to (out, in) and zero-pad to (pad, pad)."""
    w_pack, b_pack = [], []
    for w, b in zip(ws, bs):
        wt = w.T
        wt = jnp.pad(wt, ((0, pad - wt.shape[0]), (0, pad - wt.shape[1])))
        bp = jnp.pad(b, (0, pad - b.shape[0]))
        w_pack.append(wt)
        b_pack.append(bp[:, None])
    return jnp.stack(w_pack), jnp.stack(b_pack)          # (5, pad, pad), (5, pad, 1)


def make_selector(B, S, SB_pad):
    """Host-built 0/1 replicator: sel[b, c] = 1 iff c < S*B and c % B == b."""
    sel = np.zeros((B, SB_pad), np.float32)
    cols = np.arange(S * B)
    sel[cols % B, cols] = 1.0
    return jnp.asarray(sel)


# ---------------- pure-JAX reference (for correctness sanity check) ---------

def reference_forward(x, eps_valid, em_ws, em_bs, ev_ws, ev_bs, de_ws, de_bs, S):
    hp = jax.lax.Precision.HIGHEST

    def mlp(h, ws, bs):
        for i in range(len(ws) - 1):
            h = jnp.maximum(jnp.dot(h, ws[i], precision=hp) + bs[i], 0.0)
        return jnp.dot(h, ws[-1], precision=hp) + bs[-1]

    em = mlp(x, em_ws, em_bs)                                  # (B, E)
    ev = 0.05 + jax.nn.sigmoid(mlp(x, ev_ws, ev_bs))           # (B, E)
    B = x.shape[0]
    bidx = jnp.arange(S * B) % B
    z = em[bidx].T + jnp.sqrt(ev)[bidx].T * eps_valid          # (E, S*B)
    xp = jax.nn.sigmoid(mlp(z.T, de_ws, de_bs)).T              # (D, S*B)
    return em, ev, z, xp


# ------------------------------------ demo ----------------------------------

if __name__ == "__main__":
    B = 8                 # batch
    D = 16                # data_size = len(d.encoded_feature_names)
    E = 8                 # encoded_size
    S = MC_SAMPLES
    SB = S * B            # 400 valid sample columns
    SB_PAD = 512          # lane-aligned (multiple of 128)

    key = jax.random.PRNGKey(0)
    k_x, k_eps, k_em, k_ev, k_dec = jax.random.split(key, 5)

    x = jax.random.uniform(k_x, (B, D), jnp.float32)           # torch-style (B, D)
    # eps ~ N(0,1) iid: generate directly in the kernel-native (E, SB_PAD) layout,
    # so no reshape/transpose is needed around the kernel.
    eps = jax.random.normal(k_eps, (E, SB_PAD), jnp.float32)

    enc_dims = [D, 20, 16, 14, 12, E]
    dec_dims = [E, 12, 14, 16, 20, D]
    em_ws, em_bs = build_stack(k_em, enc_dims)                 # encoder_mean
    ev_ws, ev_bs = build_stack(k_ev, enc_dims)                 # encoder_var
    de_ws, de_bs = build_stack(k_dec, dec_dims)                # decoder_mean

    # pad widths: fused encoder max dim = 20+20 = 40; decoder max dim = 20.
    w_enc, b_enc = pack_fused_encoder(em_ws, em_bs, ev_ws, ev_bs, pad=40)
    w_dec, b_dec = pack_decoder(de_ws, de_bs, pad=20)
    sel = make_selector(B, S, SB_PAD)

    fwd = jax.jit(autoencoder_forward)
    res = fwd(x.T, eps, sel, w_enc, b_enc, w_dec, b_dec)       # x.T: only layout op left
    jax.block_until_ready(res["x_pred"])

    # kernel-native layouts
    assert res["em"].shape == (E, B)
    assert res["ev"].shape == (E, B)
    assert res["z"].shape == (E, SB_PAD)
    assert res["x_pred"].shape == (D, SB_PAD)

    # One-time conversion to the torch-style per-sample layout (verification only;
    # production consumers should keep the kernel-native lane-dense layout).
    z_sbe = res["z"][:, :SB].T.reshape(S, B, E)
    xp_sbd = res["x_pred"][:, :SB].T.reshape(S, B, D)
    assert z_sbe.shape == (S, B, E) and xp_sbd.shape == (S, B, D)

    # Numerical sanity check against a pure-JAX reference.
    em_r, ev_r, z_r, xp_r = reference_forward(
        x, eps[:, :SB], em_ws, em_bs, ev_ws, ev_bs, de_ws, de_bs, S)
    for got, ref in ((res["em"].T, em_r), (res["ev"].T, ev_r),
                     (res["z"][:, :SB], z_r), (res["x_pred"][:, :SB], xp_r)):
        err = float(jnp.max(jnp.abs(got - ref)))
        assert err < 2e-2, f"kernel/reference mismatch: max |diff| = {err}"

    print("KERNEL_OK")
</pallas_src>

<mosaic_0001>
module attributes {stable_mosaic.version = 11 : i64} {
  func.func @_autoencoder_kernel(%arg0: memref<16x8xf32, #tpu.memory_space<vmem>>, %arg1: memref<8x512xf32, #tpu.memory_space<vmem>>, %arg2: memref<8x512xf32, #tpu.memory_space<vmem>>, %arg3: memref<5x40x40xf32, #tpu.memory_space<vmem>>, %arg4: memref<5x40x1xf32, #tpu.memory_space<vmem>>, %arg5: memref<5x20x20xf32, #tpu.memory_space<vmem>>, %arg6: memref<5x20x1xf32, #tpu.memory_space<vmem>>, %arg7: memref<8x8xf32, #tpu.memory_space<vmem>>, %arg8: memref<8x8xf32, #tpu.memory_space<vmem>>, %arg9: memref<8x512xf32, #tpu.memory_space<vmem>>, %arg10: memref<16x512xf32, #tpu.memory_space<vmem>>) attributes {dimension_semantics = [], scalar_prefetch = 0 : i64, scratch_operands = 0 : i64, tpu.core_type = #tpu.core_type<tc>} {
    %c0 = arith.constant 0 : index
    %c0_0 = arith.constant 0 : index
    %c0_1 = arith.constant 0 : index
    %0 = vector.load %arg3[%c0, %c0_0, %c0_1] : memref<5x40x40xf32, #tpu.memory_space<vmem>>, vector<1x40x40xf32>
    %1 = vector.shape_cast %0 : vector<1x40x40xf32> to vector<40x40xf32>
    %2 = vector.extract_strided_slice %1 {offsets = [0, 0], sizes = [40, 16], strides = [1, 1]} : vector<40x40xf32> to vector<40x16xf32>
    %c0_2 = arith.constant 0 : index
    %c0_3 = arith.constant 0 : index
    %3 = vector.load %arg0[%c0_2, %c0_3] : memref<16x8xf32, #tpu.memory_space<vmem>>, vector<16x8xf32>
    %cst = arith.constant dense<0.000000e+00> : vector<40x8xf32>
    %4 = tpu.matmul %2, %3, %cst {dimension_numbers = #tpu.dot_dimension_numbers<[1], [0], [0], [1], [0, 0, 1, 1], [], []>} : vector<40x16xf32>, vector<16x8xf32>, vector<40x8xf32> -> vector<40x8xf32>
    %c0_4 = arith.constant 0 : index
    %c0_5 = arith.constant 0 : index
    %c0_6 = arith.constant 0 : index
    %5 = vector.load %arg4[%c0_4, %c0_5, %c0_6] : memref<5x40x1xf32, #tpu.memory_space<vmem>>, vector<1x40x1xf32>
    %6 = vector.shape_cast %5 : vector<1x40x1xf32> to vector<40x1xf32>
    %7 = vector.broadcast %6 : vector<40x1xf32> to vector<40x8xf32>
    %8 = arith.addf %4, %7 : vector<40x8xf32>
    %cst_7 = arith.constant 0.000000e+00 : f32
    %9 = vector.broadcast %cst_7 : f32 to vector<40x8xf32>
    %10 = arith.maximumf %8, %9 : vector<40x8xf32>
    %c1 = arith.constant 1 : index
    %c0_8 = arith.constant 0 : index
    %c0_9 = arith.constant 0 : index
    %11 = vector.load %arg3[%c1, %c0_8, %c0_9] : memref<5x40x40xf32, #tpu.memory_space<vmem>>, vector<1x40x40xf32>
    %12 = vector.shape_cast %11 : vector<1x40x40xf32> to vector<40x40xf32>
    %cst_10 = arith.constant dense<0.000000e+00> : vector<40x8xf32>
    %13 = tpu.matmul %12, %10, %cst_10 {dimension_numbers = #tpu.dot_dimension_numbers<[1], [0], [0], [1], [0, 0, 1, 1], [], []>} : vector<40x40xf32>, vector<40x8xf32>, vector<40x8xf32> -> vector<40x8xf32>
    %c1_11 = arith.constant 1 : index
    %c0_12 = arith.constant 0 : index
    %c0_13 = arith.constant 0 : index
    %14 = vector.load %arg4[%c1_11, %c0_12, %c0_13] : memref<5x40x1xf32, #tpu.memory_space<vmem>>, vector<1x40x1xf32>
    %15 = vector.shape_cast %14 : vector<1x40x1xf32> to vector<40x1xf32>
    %16 = vector.broadcast %15 : vector<40x1xf32> to vector<40x8xf32>
    %17 = arith.addf %13, %16 : vector<40x8xf32>
    %cst_14 = arith.constant 0.000000e+00 : f32
    %18 = vector.broadcast %cst_14 : f32 to vector<40x8xf32>
    %19 = arith.maximumf %17, %18 : vector<40x8xf32>
    %c2 = arith.constant 2 : index
    %c0_15 = arith.constant 0 : index
    %c0_16 = arith.constant 0 : index
    %20 = vector.load %arg3[%c2, %c0_15, %c0_16] : memref<5x40x40xf32, #tpu.memory_space<vmem>>, vector<1x40x40xf32>
    %21 = vector.shape_cast %20 : vector<1x40x40xf32> to vector<40x40xf32>
    %cst_17 = arith.constant dense<0.000000e+00> : vector<40x8xf32>
    %22 = tpu.matmul %21, %19, %cst_17 {dimension_numbers = #tpu.dot_dimension_numbers<[1], [0], [0], [1], [0, 0, 1, 1], [], []>} : vector<40x40xf32>, vector<40x8xf32>, vector<40x8xf32> -> vector<40x8xf32>
    %c2_18 = arith.constant 2 : index
    %c0_19 = arith.constant 0 : index
    %c0_20 = arith.constant 0 : index
    %23 = vector.load %arg4[%c2_18, %c0_19, %c0_20] : memref<5x40x1xf32, #tpu.memory_space<vmem>>, vector<1x40x1xf32>
    %24 = vector.shape_cast %23 : vector<1x40x1xf32> to vector<40x1xf32>
    %25 = vector.broadcast %24 : vector<40x1xf32> to vector<40x8xf32>
    %26 = arith.addf %22, %25 : vector<40x8xf32>
    %cst_21 = arith.constant 0.000000e+00 : f32
    %27 = vector.broadcast %cst_21 : f32 to vector<40x8xf32>
    %28 = arith.maximumf %26, %27 : vector<40x8xf32>
    %c3 = arith.constant 3 : index
    %c0_22 = arith.constant 0 : index
    %c0_23 = arith.constant 0 : index
    %29 = vector.load %arg3[%c3, %c0_22, %c0_23] : memref<5x40x40xf32, #tpu.memory_space<vmem>>, vector<1x40x40xf32>
    %30 = vector.shape_cast %29 : vector<1x40x40xf32> to vector<40x40xf32>
    %cst_24 = arith.constant dense<0.000000e+00> : vector<40x8xf32>
    %31 = tpu.matmul %30, %28, %cst_24 {dimension_numbers = #tpu.dot_dimension_numbers<[1], [0], [0], [1], [0, 0, 1, 1], [], []>} : vector<40x40xf32>, vector<40x8xf32>, vector<40x8xf32> -> vector<40x8xf32>
    %c3_25 = arith.constant 3 : index
    %c0_26 = arith.constant 0 : index
    %c0_27 = arith.constant 0 : index
    %32 = vector.load %arg4[%c3_25, %c0_26, %c0_27] : memref<5x40x1xf32, #tpu.memory_space<vmem>>, vector<1x40x1xf32>
    %33 = vector.shape_cast %32 : vector<1x40x1xf32> to vector<40x1xf32>
    %34 = vector.broadcast %33 : vector<40x1xf32> to vector<40x8xf32>
    %35 = arith.addf %31, %34 : vector<40x8xf32>
    %cst_28 = arith.constant 0.000000e+00 : f32
    %36 = vector.broadcast %cst_28 : f32 to vector<40x8xf32>
    %37 = arith.maximumf %35, %36 : vector<40x8xf32>
    %c4 = arith.constant 4 : index
    %c0_29 = arith.constant 0 : index
    %c0_30 = arith.constant 0 : index
    %38 = vector.load %arg3[%c4, %c0_29, %c0_30] : memref<5x40x40xf32, #tpu.memory_space<vmem>>, vector<1x40x40xf32>
    %39 = vector.shape_cast %38 : vector<1x40x40xf32> to vector<40x40xf32>
    %cst_31 = arith.constant dense<0.000000e+00> : vector<40x8xf32>
    %40 = tpu.matmul %39, %37, %cst_31 {dimension_numbers = #tpu.dot_dimension_numbers<[1], [0], [0], [1], [0, 0, 1, 1], [], []>} : vector<40x40xf32>, vector<40x8xf32>, vector<40x8xf32> -> vector<40x8xf32>
    %c4_32 = arith.constant 4 : index
    %c0_33 = arith.constant 0 : index
    %c0_34 = arith.constant 0 : index
    %41 = vector.load %arg4[%c4_32, %c0_33, %c0_34] : memref<5x40x1xf32, #tpu.memory_space<vmem>>, vector<1x40x1xf32>
    %42 = vector.shape_cast %41 : vector<1x40x1xf32> to vector<40x1xf32>
    %43 = vector.broadcast %42 : vector<40x1xf32> to vector<40x8xf32>
    %44 = arith.addf %40, %43 : vector<40x8xf32>
    %45 = vector.extract_strided_slice %44 {offsets = [0, 0], sizes = [8, 8], strides = [1, 1]} : vector<40x8xf32> to vector<8x8xf32>
    %46 = vector.extract_strided_slice %44 {offsets = [8, 0], sizes = [8, 8], strides = [1, 1]} : vector<40x8xf32> to vector<8x8xf32>
    %47 = arith.negf %46 : vector<8x8xf32>
    %48 = math.exp %47 : vector<8x8xf32>
    %cst_35 = arith.constant 1.000000e+00 : f32
    %49 = vector.broadcast %cst_35 : f32 to vector<8x8xf32>
    %50 = arith.addf %49, %48 : vector<8x8xf32>
    %51 = arith.divf %49, %50 : vector<8x8xf32>
    %cst_36 = arith.constant 5.000000e-02 : f32
    %52 = vector.broadcast %cst_36 : f32 to vector<8x8xf32>
    %53 = arith.addf %52, %51 : vector<8x8xf32>
    %c0_37 = arith.constant 0 : index
    %c0_38 = arith.constant 0 : index
    %54 = vector.load %arg7[%c0_37, %c0_38] : memref<8x8xf32, #tpu.memory_space<vmem>>, vector<8x8xf32>
    tpu.vector_store %arg7[%c0_37, %c0_38], %45 {strides = array<i32>} : memref<8x8xf32, #tpu.memory_space<vmem>>, vector<8x8xf32>,
    %c0_39 = arith.constant 0 : index
    %c0_40 = arith.constant 0 : index
    %55 = vector.load %arg8[%c0_39, %c0_40] : memref<8x8xf32, #tpu.memory_space<vmem>>, vector<8x8xf32>
    tpu.vector_store %arg8[%c0_39, %c0_40], %53 {strides = array<i32>} : memref<8x8xf32, #tpu.memory_space<vmem>>, vector<8x8xf32>,
    %56 = math.sqrt %53 : vector<8x8xf32>
    %57 = tpu.concatenate %45, %56 in 0 : vector<8x8xf32>, vector<8x8xf32> -> vector<16x8xf32>
    %c0_41 = arith.constant 0 : index
    %c0_42 = arith.constant 0 : index
    %58 = vector.load %arg2[%c0_41, %c0_42] : memref<8x512xf32, #tpu.memory_space<vmem>>, vector<8x512xf32>
    %cst_43 = arith.constant dense<0.000000e+00> : vector<16x512xf32>
    %59 = tpu.matmul %57, %58, %cst_43 {dimension_numbers = #tpu.dot_dimension_numbers<[1], [0], [0], [1], [0, 0, 1, 1], [], []>} : vector<16x8xf32>, vector<8x512xf32>, vector<16x512xf32> -> vector<16x512xf32>
    %60 = vector.extract_strided_slice %59 {offsets = [0, 0], sizes = [8, 512], strides = [1, 1]} : vector<16x512xf32> to vector<8x512xf32>
    %61 = vector.extract_strided_slice %59 {offsets = [8, 0], sizes = [8, 512], strides = [1, 1]} : vector<16x512xf32> to vector<8x512xf32>
    %c0_44 = arith.constant 0 : index
    %c0_45 = arith.constant 0 : index
    %62 = vector.load %arg1[%c0_44, %c0_45] : memref<8x512xf32, #tpu.memory_space<vmem>>, vector<8x512xf32>
    %63 = arith.mulf %61, %62 : vector<8x512xf32>
    %64 = arith.addf %60, %63 : vector<8x512xf32>
    %c0_46 = arith.constant 0 : index
    %c0_47 = arith.constant 0 : index
    %65 = vector.load %arg9[%c0_46, %c0_47] : memref<8x512xf32, #tpu.memory_space<vmem>>, vector<8x512xf32>
    tpu.vector_store %arg9[%c0_46, %c0_47], %64 {strides = array<i32>} : memref<8x512xf32, #tpu.memory_space<vmem>>, vector<8x512xf32>,
    %c0_48 = arith.constant 0 : index
    %c0_49 = arith.constant 0 : index
    %c0_50 = arith.constant 0 : index
    %66 = vector.load %arg5[%c0_48, %c0_49, %c0_50] : memref<5x20x20xf32, #tpu.memory_space<vmem>>, vector<1x20x20xf32>
    %67 = vector.shape_cast %66 : vector<1x20x20xf32> to vector<20x20xf32>
    %68 = vector.extract_strided_slice %67 {offsets = [0, 0], sizes = [20, 8], strides = [1, 1]} : vector<20x20xf32> to vector<20x8xf32>
    %cst_51 = arith.constant dense<0.000000e+00> : vector<20x512xf32>
    %69 = tpu.matmul %68, %64, %cst_51 {dimension_numbers = #tpu.dot_dimension_numbers<[1], [0], [0], [1], [0, 0, 1, 1], [], []>} : vector<20x8xf32>, vector<8x512xf32>, vector<20x512xf32> -> vector<20x512xf32>
    %c0_52 = arith.constant 0 : index
    %c0_53 = arith.constant 0 : index
    %c0_54 = arith.constant 0 : index
    %70 = vector.load %arg6[%c0_52, %c0_53, %c0_54] : memref<5x20x1xf32, #tpu.memory_space<vmem>>, vector<1x20x1xf32>
    %71 = vector.shape_cast %70 : vector<1x20x1xf32> to vector<20x1xf32>
    %72 = vector.broadcast %71 : vector<20x1xf32> to vector<20x512xf32>
    %73 = arith.addf %69, %72 : vector<20x512xf32>
    %cst_55 = arith.constant 0.000000e+00 : f32
    %74 = vector.broadcast %cst_55 : f32 to vector<20x512xf32>
    %75 = arith.maximumf %73, %74 : vector<20x512xf32>
    %c1_56 = arith.constant 1 : index
    %c0_57 = arith.constant 0 : index
    %c0_58 = arith.constant 0 : index
    %76 = vector.load %arg5[%c1_56, %c0_57, %c0_58] : memref<5x20x20xf32, #tpu.memory_space<vmem>>, vector<1x20x20xf32>
    %77 = vector.shape_cast %76 : vector<1x20x20xf32> to vector<20x20xf32>
    %cst_59 = arith.constant dense<0.000000e+00> : vector<20x512xf32>
    %78 = tpu.matmul %77, %75, %cst_59 {dimension_numbers = #tpu.dot_dimension_numbers<[1], [0], [0], [1], [0, 0, 1, 1], [], []>} : vector<20x20xf32>, vector<20x512xf32>, vector<20x512xf32> -> vector<20x512xf32>
    %c1_60 = arith.constant 1 : index
    %c0_61 = arith.constant 0 : index
    %c0_62 = arith.constant 0 : index
    %79 = vector.load %arg6[%c1_60, %c0_61, %c0_62] : memref<5x20x1xf32, #tpu.memory_space<vmem>>, vector<1x20x1xf32>
    %80 = vector.shape_cast %79 : vector<1x20x1xf32> to vector<20x1xf32>
    %81 = vector.broadcast %80 : vector<20x1xf32> to vector<20x512xf32>
    %82 = arith.addf %78, %81 : vector<20x512xf32>
    %cst_63 = arith.constant 0.000000e+00 : f32
    %83 = vector.broadcast %cst_63 : f32 to vector<20x512xf32>
    %84 = arith.maximumf %82, %83 : vector<20x512xf32>
    %c2_64 = arith.constant 2 : index
    %c0_65 = arith.constant 0 : index
    %c0_66 = arith.constant 0 : index
    %85 = vector.load %arg5[%c2_64, %c0_65, %c0_66] : memref<5x20x20xf32, #tpu.memory_space<vmem>>, vector<1x20x20xf32>
    %86 = vector.shape_cast %85 : vector<1x20x20xf32> to vector<20x20xf32>
    %cst_67 = arith.constant dense<0.000000e+00> : vector<20x512xf32>
    %87 = tpu.matmul %86, %84, %cst_67 {dimension_numbers = #tpu.dot_dimension_numbers<[1], [0], [0], [1], [0, 0, 1, 1], [], []>} : vector<20x20xf32>, vector<20x512xf32>, vector<20x512xf32> -> vector<20x512xf32>
    %c2_68 = arith.constant 2 : index
    %c0_69 = arith.constant 0 : index
    %c0_70 = arith.constant 0 : index
    %88 = vector.load %arg6[%c2_68, %c0_69, %c0_70] : memref<5x20x1xf32, #tpu.memory_space<vmem>>, vector<1x20x1xf32>
    %89 = vector.shape_cast %88 : vector<1x20x1xf32> to vector<20x1xf32>
    %90 = vector.broadcast %89 : vector<20x1xf32> to vector<20x512xf32>
    %91 = arith.addf %87, %90 : vector<20x512xf32>
    %cst_71 = arith.constant 0.000000e+00 : f32
    %92 = vector.broadcast %cst_71 : f32 to vector<20x512xf32>
    %93 = arith.maximumf %91, %92 : vector<20x512xf32>
    %c3_72 = arith.constant 3 : index
    %c0_73 = arith.constant 0 : index
    %c0_74 = arith.constant 0 : index
    %94 = vector.load %arg5[%c3_72, %c0_73, %c0_74] : memref<5x20x20xf32, #tpu.memory_space<vmem>>, vector<1x20x20xf32>
    %95 = vector.shape_cast %94 : vector<1x20x20xf32> to vector<20x20xf32>
    %cst_75 = arith.constant dense<0.000000e+00> : vector<20x512xf32>
    %96 = tpu.matmul %95, %93, %cst_75 {dimension_numbers = #tpu.dot_dimension_numbers<[1], [0], [0], [1], [0, 0, 1, 1], [], []>} : vector<20x20xf32>, vector<20x512xf32>, vector<20x512xf32> -> vector<20x512xf32>
    %c3_76 = arith.constant 3 : index
    %c0_77 = arith.constant 0 : index
    %c0_78 = arith.constant 0 : index
    %97 = vector.load %arg6[%c3_76, %c0_77, %c0_78] : memref<5x20x1xf32, #tpu.memory_space<vmem>>, vector<1x20x1xf32>
    %98 = vector.shape_cast %97 : vector<1x20x1xf32> to vector<20x1xf32>
    %99 = vector.broadcast %98 : vector<20x1xf32> to vector<20x512xf32>
    %100 = arith.addf %96, %99 : vector<20x512xf32>
    %cst_79 = arith.constant 0.000000e+00 : f32
    %101 = vector.broadcast %cst_79 : f32 to vector<20x512xf32>
    %102 = arith.maximumf %100, %101 : vector<20x512xf32>
    %c4_80 = arith.constant 4 : index
    %c0_81 = arith.constant 0 : index
    %c0_82 = arith.constant 0 : index
    %103 = vector.load %arg5[%c4_80, %c0_81, %c0_82] : memref<5x20x20xf32, #tpu.memory_space<vmem>>, vector<1x20x20xf32>
    %104 = vector.shape_cast %103 : vector<1x20x20xf32> to vector<20x20xf32>
    %cst_83 = arith.constant dense<0.000000e+00> : vector<20x512xf32>
    %105 = tpu.matmul %104, %102, %cst_83 {dimension_numbers = #tpu.dot_dimension_numbers<[1], [0], [0], [1], [0, 0, 1, 1], [], []>} : vector<20x20xf32>, vector<20x512xf32>, vector<20x512xf32> -> vector<20x512xf32>
    %c4_84 = arith.constant 4 : index
    %c0_85 = arith.constant 0 : index
    %c0_86 = arith.constant 0 : index
    %106 = vector.load %arg6[%c4_84, %c0_85, %c0_86] : memref<5x20x1xf32, #tpu.memory_space<vmem>>, vector<1x20x1xf32>
    %107 = vector.shape_cast %106 : vector<1x20x1xf32> to vector<20x1xf32>
    %108 = vector.broadcast %107 : vector<20x1xf32> to vector<20x512xf32>
    %109 = arith.addf %105, %108 : vector<20x512xf32>
    %110 = vector.extract_strided_slice %109 {offsets = [0, 0], sizes = [16, 512], strides = [1, 1]} : vector<20x512xf32> to vector<16x512xf32>
    %111 = arith.negf %110 : vector<16x512xf32>
    %112 = math.exp %111 : vector<16x512xf32>
    %cst_87 = arith.constant 1.000000e+00 : f32
    %113 = vector.broadcast %cst_87 : f32 to vector<16x512xf32>
    %114 = arith.addf %113, %112 : vector<16x512xf32>
    %115 = arith.divf %113, %114 : vector<16x512xf32>
    %c0_88 = arith.constant 0 : index
    %c0_89 = arith.constant 0 : index
    %116 = vector.load %arg10[%c0_88, %c0_89] : memref<16x512xf32, #tpu.memory_space<vmem>>, vector<16x512xf32>
    tpu.vector_store %arg10[%c0_88, %c0_89], %115 {strides = array<i32>} : memref<16x512xf32, #tpu.memory_space<vmem>>, vector<16x512xf32>,
    return
  }
}

</mosaic_0001>

<bundles_post_ra>
// kernel: autoencoder_forward.1
= control target key start
LH: loop header
LB: loop body
LE: loop exit
PB: predicated region body
PF: predicated region fallthrough
CT: control target
= control target key end

     0   :  { %16 = vsyncpa [#allocation3], 0  ;;  %s3251_s0 = inlined_call_operand.vmem [shape: f32[16,8], index: 0, kind: input, shape index: {}]   ;;  %s3252_s1 = inlined_call_operand.vmem [shape: f32[8,512], index: 1, kind: input, shape index: {}]   ;;  %s3253_s2 = inlined_call_operand.hbm [shape: f32[8,512], index: 2, kind: input, shape index: {}]   ;;  %s3254_s3 = inlined_call_operand.vmem [shape: f32[5,40,40], index: 3, kind: input, shape index: {}]   ;;  %s3255_s4 = inlined_call_operand.vmem [shape: f32[5,40,1], index: 4, kind: input, shape index: {}]   ;;  %s3256_s5 = inlined_call_operand.vmem [shape: f32[5,20,20], index: 5, kind: input, shape index: {}]   ;;  %s3257_s6 = inlined_call_operand.vmem [shape: f32[5,20,1], index: 6, kind: input, shape index: {}]   ;;  %s3258_s7 = inlined_call_operand.hbm [shape: f32[8,8], index: 7, kind: output, shape index: {0}]   ;;  %s3259_s8 = inlined_call_operand.hbm [shape: f32[8,8], index: 8, kind: output, shape index: {1}]   ;;  %s3260_s9 = inlined_call_operand.hbm [shape: f32[8,512], index: 9, kind: output, shape index: {2}]   ;;  %s3261_s10 = inlined_call_operand.hbm [shape: f32[16,512], index: 10, kind: output, shape index: {3}]  }
   0x1   :  { %17 = vsyncpa [#allocation4], 0 }
   0x2   :  { %18 = vsyncpa [#allocation7], 0 }
   0x3   :  { %19 = vsyncpa [#allocation10], 0  ;;  %s2705_s13 = smov [#allocation2]   ;;  %s2587_s17 = scalar_lea.hbm %s3253_s2, 512 }
   0x4   :  { %s30_s14 = sshll.u32 %s2705_s13, 4  ;;  %p2588_p0 = scmp.ne.s32.totalorder %s3253_s2, %s2587_s17  ;;  %s31_s14 = int_to_ptr.vmem [resolvable:$true] %s30_s14 }
   0x5   :  { %p2591_p1 = scmp.lt.u32.totalorder %s2587_s17, %s3253_s2 }
   0x7   :  { %p2593_p2 = pnand %p2591_p1, %p2588_p0 }
   0x9   :  { %2596 = shalt.err (!%p2593_p2)
}
   0xa   :  { %s2597_s22 = scalar_lea.vmem %s31_s14, 512  ;;  %p2602_p4 = scmp.lt.s32.totalorder %s31_s14, %s31_s14 }
   0xb   :  { %p2598_p3 = scmp.ne.s32.totalorder %s31_s14, %s2597_s22  ;;  %p2603_p5 = scmp.lt.s32.totalorder %s2597_s22, %s2597_s22 }
   0xd   :  { %p2604_p6 = por %p2603_p5, %p2602_p4 }
   0xf   :  { %p2605_p7 = pnand %p2604_p6, %p2598_p3 }
  0x11   :  { %2608 = shalt.err (!%p2605_p7)
}
  0x12   :  { %33 = dma.hbm_to_vmem [thread:$0]  %s3253_s2, 512, %s31_s14, [#allocation3]  }
  0x13   :  { %2697 = dma.done.wait [#allocation3], 512  }
  0x14   :  { %2698 = vsyncadd [#allocation3], 4294966784  ;;  %v2706_v0 = vmov 0.0|0.0   ;;  %vm2707_vm0 = vmmov 0   ;;  %v2708_v1 = vmov 0.0   ;;  %v2709_v2 = vmov 0  }
  0x15   :  { %2477 = vmatprep.subr.bf16.mxu0 %v2706_v0  ;;  %2362 = vmatprep.mubr.msk.f32.mxu0 %vm2707_vm0, %v2708_v1  ;;  %v50_v3 = vld [vmem:[%s3251_s0] sm:$0xff]  ;;  %v51_v4 = vld [vmem:[%s3251_s0 + $0x8] sm:$0xff]  ;;  %v54_v7 = vld [vmem:[%s3255_s4 + $0x10] sm:$0xff]  ;;  %vm82_vm1 = vcmask 130048   ;;  %vm230_vm2 = vcmask 326656   ;;  %vm778_vm3 = vcmask 64512  }
  0x16   :  { %2547 = vset.pattern.permute.xlu0 %v2709_v2  ;;  %2548 = vset.pattern.permute.xlu1 %v2709_v2  ;;  %v2478_v5 = vpack.c.bf16 %v51_v4, %v50_v3  ;;  %v52_v6 = vld [vmem:[%s3255_s4] sm:$0xff]  ;;  %v53_v9 = vld [vmem:[%s3255_s4 + $0x8] sm:$0xff]  ;;  %v55_v10 = vld [vmem:[%s3255_s4 + $0x18] sm:$0xff]  ;;  %vm1209_vm6 = vcmask 1043456   ;;  %vm1199_vm7 = vcmask 162816  }
  0x17   :  { %2480 = vmatprep.subr.bf16.mxu1 %v2706_v0  ;;  %2387 = vmatprep.mubr.msk.f32.mxu1 %vm2707_vm0, %v2708_v1  ;;  %v45_v8 = vld [vmem:[%s3254_s3] sm:$0xff]  ;;  %v46_v11 = vld [vmem:[%s3254_s3 + $0x8] sm:$0xff]  ;;  %v47_v14 = vld [vmem:[%s3254_s3 + $0x10] sm:$0xff] }
  0x18   :  { %2479 = vmatpush3.bf16.msra.mxu0 %v2478_v5  ;;  %59 = vperm.xlu0 %2547, %v52_v6   ;;  %v56_v12 = vld [vmem:[%s3255_s4 + $0x20] sm:$0xff]  ;;  %v2173_v13 = vld [vmem:[%s3255_s4 + $0x28] sm:$0xff]  ;;  %v2174_v15 = vld [vmem:[%s3255_s4 + $0x30] sm:$0xff] }
  0x19   :  { %69 = vperm.xlu1 %2548, %v54_v7   ;;  %2486 = vmatprep.subr.bf16.mxu0 %v2706_v0  ;;  %v2175_v16 = vld [vmem:[%s3255_s4 + $0x38] sm:$0xff]  ;;  %v2176_v18 = vld [vmem:[%s3255_s4 + $0x40] sm:$0xff]  ;;  %v2177_v19 = vld [vmem:[%s3255_s4 + $0x48] sm:$0xff] }
  0x1a   :  { %v48_v17 = vld [vmem:[%s3254_s3 + $0x18] sm:$0xff]  ;;  %v49_v20 = vld [vmem:[%s3254_s3 + $0x20] sm:$0xff]  ;;  %v2188_v21 = vld [vmem:[%s3255_s4 + $0x50] sm:$0xff] }
  0x1b   :  { %2363 = vmatmul.mubr.msk.f32.vlgmr.msra.gmra.mrb[0].mxu0 %vm82_vm1, %v45_v8  ;;  %v2189_v22 = vld [vmem:[%s3255_s4 + $0x58] sm:$0xff]  ;;  %v2190_v23 = vld [vmem:[%s3255_s4 + $0x60] sm:$0xff]  ;;  %v2191_v24 = vld [vmem:[%s3255_s4 + $0x68] sm:$0xff] }
  0x1c   :  { %2365 = vmatprep.mubr.msk.f32.mxu0 %vm2707_vm0, %v2708_v1  ;;  %64 = vperm.xlu0 %2547, %v53_v9   ;;  %v2192_v25 = vld [vmem:[%s3255_s4 + $0x70] sm:$0xff]  ;;  %v2203_v26 = vld [vmem:[%s3255_s4 + $0x78] sm:$0xff]  ;;  %v2204_v27 = vld [vmem:[%s3255_s4 + $0x80] sm:$0xff] }
  0x1d   :  { %74 = vperm.xlu1 %2548, %v55_v10   ;;  %v2205_v28 = vld [vmem:[%s3255_s4 + $0x88] sm:$0xff]  ;;  %v2206_v29 = vld [vmem:[%s3255_s4 + $0x90] sm:$0xff]  ;;  %v2207_v30 = vld [vmem:[%s3255_s4 + $0x98] sm:$0xff] }
  0x1e   :  { %v2219_v31 = vld [vmem:[%s3255_s4 + $0xa8] sm:$0xff]  ;;  %v2218_v32 = vld [vmem:[%s3255_s4 + $0xa0] sm:$0xff]  ;;  %v973_v35 = vld [vmem:[%s3257_s6 + $0x10] sm:$0xf]  ;;  %s2711_s4 = smov [#allocation5]  }
  0x1f   :  { %2366 = vmatmul.mubr.msk.f32.gmra.mrb[2].mxu0 %vm82_vm1, %v46_v11  ;;  %v971_v33 = vld [vmem:[%s3257_s6] sm:$0xff]  ;;  %v972_v34 = vld [vmem:[%s3257_s6 + $0x8] sm:$0xff]  ;;  %v2242_v36 = vld [vmem:[%s3257_s6 + $0x18] sm:$0xff]  ;;  %s2111_s25 = sshll.u32 %s2711_s4, 4  ;;  %s2112_s25 = int_to_ptr.vmem [resolvable:$true] %s2111_s25 }
  0x20   :  { %2368 = vmatprep.mubr.msk.f32.mxu0 %vm2707_vm0, %v2708_v1  ;;  %79 = vperm.xlu0 %2547, %v56_v12   ;;  %v2243_v37 = vld [vmem:[%s3257_s6 + $0x20] sm:$0xff]  ;;  %v2244_v38 = vld [vmem:[%s3257_s6 + $0x28] sm:$0xf]  ;;  %v2258_v39 = vld [vmem:[%s3257_s6 + $0x30] sm:$0xff] }
  0x21   :  { %207 = vperm.xlu1 %2548, %v2173_v13   ;;  %v2259_v40 = vld [vmem:[%s3257_s6 + $0x38] sm:$0xff]  ;;  %v2260_v41 = vld [vmem:[%s3257_s6 + $0x40] sm:$0xf]  ;;  %v2274_v42 = vld [vmem:[%s3257_s6 + $0x48] sm:$0xff] }
  0x22   :  { %v2275_v43 = vld [vmem:[%s3257_s6 + $0x50] sm:$0xff]  ;;  %v2276_v44 = vld [vmem:[%s3257_s6 + $0x58] sm:$0xf]  ;;  %v2290_v45 = vld [vmem:[%s3257_s6 + $0x60] sm:$0xff] }
  0x23   :  { %2369 = vmatmul.mubr.msk.f32.gmra.mrb[4].mxu0 %vm82_vm1, %v47_v14  ;;  %v2291_v46 = vld [vmem:[%s3257_s6 + $0x68] sm:$0xff]  ;;  %v2169_v13 = vld [vmem:[%s3254_s3 + $0x30] sm:$0xff]  ;;  %v2170_v14 = vld [vmem:[%s3254_s3 + $0x38] sm:$0xff] }
  0x24   :  { %2371 = vmatprep.mubr.msk.f32.mxu0 %vm2707_vm0, %v2708_v1  ;;  %212 = vperm.xlu0 %2547, %v2174_v15   ;;  %v2168_v12 = vld [vmem:[%s3254_s3 + $0x28] sm:$0xff]  ;;  %v2171_v15 = vld [vmem:[%s3254_s3 + $0x40] sm:$0xff] }
  0x25   :  { %217 = vperm.xlu1 %2548, %v2175_v16   ;;  %v2172_v16 = vld [vmem:[%s3254_s3 + $0x48] sm:$0xff] }
  0x27   :  { %2372 = vmatmul.mubr.msk.f32.gmra.mrb[6].mxu0 %vm82_vm1, %v48_v17 }
  0x28   :  { %2374 = vmatprep.mubr.msk.f32.mxu0 %vm2707_vm0, %v2708_v1  ;;  %222 = vperm.xlu0 %2547, %v2176_v18  }
  0x29   :  { %227 = vperm.xlu1 %2548, %v2177_v19  }
  0x2b   :  { %2375 = vmatmul.mubr.msk.f32.gmra.mrb[8].mxu0 %vm82_vm1, %v49_v20 }
  0x2c   :  { %355 = vperm.xlu0 %2547, %v2188_v21   ;;  %2412 = vmatprep.mubr.msk.f32.mxu0 %vm2707_vm0, %v2708_v1 }
  0x2d   :  { %360 = vperm.xlu1 %2548, %v2189_v22  }
  0x30   :  { %365 = vperm.xlu0 %2547, %v2190_v23  }
  0x31   :  { %370 = vperm.xlu1 %2548, %v2191_v24  }
  0x34   :  { %375 = vperm.xlu0 %2547, %v2192_v25  }
  0x35   :  { %502 = vperm.xlu1 %2548, %v2203_v26  }
  0x38   :  { %507 = vperm.xlu0 %2547, %v2204_v27  }
  0x39   :  { %512 = vperm.xlu1 %2548, %v2205_v28  }
  0x3c   :  { %517 = vperm.xlu0 %2547, %v2206_v29  }
  0x3d   :  { %522 = vperm.xlu1 %2548, %v2207_v30  }
  0x40   :  { %654 = vperm.xlu0 %2547, %v2219_v31  }
  0x41   :  { %649 = vperm.xlu1 %2548, %v2218_v32  }
  0x44   :  { %976 = vperm.xlu0 %2547, %v971_v33  }
  0x45   :  { %981 = vperm.xlu1 %2548, %v972_v34  }
  0x48   :  { %986 = vperm.xlu0 %2547, %v973_v35  }
  0x49   :  { %1186 = vperm.xlu1 %2548, %v2242_v36  }
  0x4c   :  { %1191 = vperm.xlu0 %2547, %v2243_v37  }
  0x4d   :  { %1196 = vperm.xlu1 %2548, %v2244_v38  }
  0x50   :  { %1410 = vperm.xlu0 %2547, %v2258_v39  }
  0x51   :  { %1415 = vperm.xlu1 %2548, %v2259_v40  }
  0x54   :  { %1420 = vperm.xlu0 %2547, %v2260_v41  }
  0x55   :  { %1632 = vperm.xlu1 %2548, %v2274_v42  }
  0x58   :  { %1637 = vperm.xlu0 %2547, %v2275_v43  }
  0x59   :  { %1642 = vperm.xlu1 %2548, %v2276_v44   ;;  %v2183_v44 = vld [vmem:[%s3254_s3 + $0x50] sm:$0xff] }
  0x5c   :  { %1854 = vperm.xlu0 %2547, %v2290_v45   ;;  %v2184_v45 = vld [vmem:[%s3254_s3 + $0x58] sm:$0xff] }
  0x5d   :  { %1859 = vperm.xlu1 %2548, %v2291_v46   ;;  %v2185_v46 = vld [vmem:[%s3254_s3 + $0x60] sm:$0xff] }
  0x97   :  { %v60_v47 = vpop.permute.xlu0 %59 }
  0x98   :  { %v70_v55 = vpop.permute.xlu1 %69 }
  0x9b   :  { %v65_v51 = vpop.permute.xlu0 %64 }
  0x9c   :  { %v75_v62 = vpop.permute.xlu1 %74 }
  0x9f   :  { %v80_v6 = vpop.permute.xlu0 %79 }
  0xa0   :  { %v208_v19 = vpop.permute.xlu1 %207 }
  0xa3   :  { %v213_v21 = vpop.permute.xlu0 %212 }
  0xa4   :  { %v218_v30 = vpop.permute.xlu1 %217 }
  0xa7   :  { %v223_v32 = vpop.permute.xlu0 %222 }
  0xa8   :  { %v228_v38 = vpop.permute.xlu1 %227 }
  0xee   :  { %v164_v48 = vpop.f32.mrb[0].mxu0 }
  0xef   :  { %v2364_v49 = vpop.f32.mrb[1].mxu0  ;;  %v165_v50 = vadd.f32 %v164_v48, %v60_v47  ;;  %v2186_v47 = vld [vmem:[%s3254_s3 + $0x68] sm:$0xff]  ;;  %v2187_v48 = vld [vmem:[%s3254_s3 + $0x70] sm:$0xff] }
  0xf1   :  { %v188_v56 = vmax.f32 %v165_v50, 0.0 }
  0xf2   :  { %v169_v52 = vpop.f32.mrb[2].mxu0 }
  0xf3   :  { %v170_v53 = vadd.f32 %v169_v52, %v65_v51  ;;  %v2367_v54 = vpop.f32.mrb[3].mxu0  ;;  %v356_v51 = vpop.permute.xlu0 %355 }
  0xf5   :  { %v189_v57 = vmax.f32 %v170_v53, 0.0  ;;  %v361_v53 = vpop.permute.xlu1 %360 }
  0xf6   :  { %v174_v58 = vpop.f32.mrb[4].mxu0 }
  0xf7   :  { %v2370_v59 = vpop.f32.mrb[5].mxu0  ;;  %v2481_v60 = vpack.c.bf16 %v189_v57, %v188_v56  ;;  %v175_v61 = vadd.f32 %v174_v58, %v70_v55 }
  0xf9   :  { %2482 = vmatpush3.bf16.msra.mxu1 %v2481_v60  ;;  %v190_v4 = vmax.f32 %v175_v61, 0.0 }
  0xfa   :  { %v179_v63 = vpop.f32.mrb[6].mxu0  ;;  %2483 = vmatprep.subr.bf16.mxu1 %v2706_v0 }
  0xfb   :  { %v180_v2 = vadd.f32 %v179_v63, %v75_v62  ;;  %v2373_v3 = vpop.f32.mrb[7].mxu0  ;;  %v366_v62 = vpop.permute.xlu0 %365 }
  0xfd   :  { %v191_v5 = vmax.f32 %v180_v2, 0.0  ;;  %v371_v2 = vpop.permute.xlu1 %370 }
  0xfe   :  { %v184_v7 = vpop.f32.mrb[8].mxu0 }
  0xff   :  { %v2484_v8 = vpack.c.bf16 %v191_v5, %v190_v4  ;;  %v185_v9 = vadd.f32 %v184_v7, %v80_v6  ;;  %v2376_v10 = vpop.f32.mrb[9].mxu0 }
 0x101   :  { %2485 = vmatpush3.bf16.msra.mxu1 %v2484_v8  ;;  %v192_v11 = vmax.f32 %v185_v9, 0.0  ;;  %v376_v8 = vpop.permute.xlu0 %375 }
 0x102   :  { %2385 = vmatprep.subr.mxu1 %v2708_v1 }
 0x105   :  { %2386 = vmatpush3.msra.mxu1 %v192_v11 }
 0x106   :  { %2388 = vmatmul.mubr.msk.f32.vlgmr.msra.gmra.mrb[0].mxu1 %vm230_vm2, %v2168_v12  ;;  %2492 = vmatprep.subr.bf16.mxu1 %v2706_v0 }
 0x107   :  { %2390 = vmatprep.mubr.msk.f32.mxu1 %vm2707_vm0, %v2708_v1 }
 0x10a   :  { %2391 = vmatmul.mubr.msk.f32.gmra.mrb[2].mxu1 %vm230_vm2, %v2169_v13 }
 0x10b   :  { %2393 = vmatprep.mubr.msk.f32.mxu1 %vm2707_vm0, %v2708_v1 }
 0x10e   :  { %2394 = vmatmul.mubr.msk.f32.gmra.mrb[4].mxu1 %vm230_vm2, %v2170_v14  ;;  %v2198_v14 = vld [vmem:[%s3254_s3 + $0x78] sm:$0xff] }
 0x10f   :  { %2396 = vmatprep.mubr.msk.f32.mxu1 %vm2707_vm0, %v2708_v1 }
 0x112   :  { %2397 = vmatmul.mubr.msk.f32.gmra.mrb[6].mxu1 %vm230_vm2, %v2171_v15  ;;  %v2199_v15 = vld [vmem:[%s3254_s3 + $0x80] sm:$0xff] }
 0x113   :  { %2399 = vmatprep.mubr.msk.f32.mxu1 %vm2707_vm0, %v2708_v1 }
 0x116   :  { %2400 = vmatmul.mubr.msk.f32.gmra.mrb[8].mxu1 %vm230_vm2, %v2172_v16  ;;  %v2200_v16 = vld [vmem:[%s3254_s3 + $0x88] sm:$0xff] }
 0x117   :  { %2437 = vmatprep.mubr.msk.f32.mxu1 %vm2707_vm0, %v2708_v1 }
 0x1d9   :  { %v312_v17 = vpop.f32.mrb[0].mxu1 }
 0x1da   :  { %v2389_v18 = vpop.f32.mrb[1].mxu1  ;;  %v313_v20 = vadd.f32 %v312_v17, %v208_v19  ;;  %v2201_v17 = vld [vmem:[%s3254_s3 + $0x90] sm:$0xff] }
 0x1db   :  { %v2202_v18 = vld [vmem:[%s3254_s3 + $0x98] sm:$0xff] }
 0x1dc   :  { %v336_v25 = vmax.f32 %v313_v20, 0.0 }
 0x1dd   :  { %v317_v22 = vpop.f32.mrb[2].mxu1 }
 0x1de   :  { %v318_v23 = vadd.f32 %v317_v22, %v213_v21  ;;  %v2392_v24 = vpop.f32.mrb[3].mxu1  ;;  %v503_v21 = vpop.permute.xlu1 %502 }
 0x1e0   :  { %v337_v26 = vmax.f32 %v318_v23, 0.0  ;;  %v508_v23 = vpop.permute.xlu0 %507 }
 0x1e1   :  { %v322_v27 = vpop.f32.mrb[4].mxu1 }
 0x1e2   :  { %v2487_v28 = vpack.c.bf16 %v337_v26, %v336_v25  ;;  %v2395_v29 = vpop.f32.mrb[5].mxu1  ;;  %v323_v31 = vadd.f32 %v322_v27, %v218_v30 }
 0x1e4   :  { %2488 = vmatpush3.bf16.msra.mxu0 %v2487_v28  ;;  %v338_v36 = vmax.f32 %v323_v31, 0.0 }
 0x1e5   :  { %v327_v33 = vpop.f32.mrb[6].mxu1  ;;  %2489 = vmatprep.subr.bf16.mxu0 %v2706_v0 }
 0x1e6   :  { %v328_v34 = vadd.f32 %v327_v33, %v223_v32  ;;  %v2398_v35 = vpop.f32.mrb[7].mxu1  ;;  %v513_v32 = vpop.permute.xlu1 %512 }
 0x1e8   :  { %v339_v37 = vmax.f32 %v328_v34, 0.0  ;;  %v518_v34 = vpop.permute.xlu0 %517 }
 0x1e9   :  { %v332_v39 = vpop.f32.mrb[8].mxu1 }
 0x1ea   :  { %v2490_v40 = vpack.c.bf16 %v339_v37, %v338_v36  ;;  %v333_v41 = vadd.f32 %v332_v39, %v228_v38  ;;  %v2401_v42 = vpop.f32.mrb[9].mxu1 }
 0x1ec   :  { %2491 = vmatpush3.bf16.msra.mxu0 %v2490_v40  ;;  %v340_v43 = vmax.f32 %v333_v41, 0.0  ;;  %v523_v40 = vpop.permute.xlu1 %522 }
 0x1ed   :  { %2410 = vmatprep.subr.mxu0 %v2708_v1 }
 0x1f0   :  { %2411 = vmatpush3.msra.mxu0 %v340_v43 }
 0x1f1   :  { %2413 = vmatmul.mubr.msk.f32.vlgmr.msra.gmra.mrb[10].mxu0 %vm230_vm2, %v2183_v44  ;;  %2498 = vmatprep.subr.bf16.mxu0 %v2706_v0 }
 0x1f2   :  { %2415 = vmatprep.mubr.msk.f32.mxu0 %vm2707_vm0, %v2708_v1 }
 0x1f5   :  { %2416 = vmatmul.mubr.msk.f32.gmra.mrb[12].mxu0 %vm230_vm2, %v2184_v45 }
 0x1f6   :  { %2418 = vmatprep.mubr.msk.f32.mxu0 %vm2707_vm0, %v2708_v1 }
 0x1f9   :  { %2419 = vmatmul.mubr.msk.f32.gmra.mrb[14].mxu0 %vm230_vm2, %v2185_v46  ;;  %v2213_v46 = vld [vmem:[%s3254_s3 + $0xa0] sm:$0xff] }
 0x1fa   :  { %2421 = vmatprep.mubr.msk.f32.mxu0 %vm2707_vm0, %v2708_v1 }
 0x1fd   :  { %2422 = vmatmul.mubr.msk.f32.gmra.mrb[16].mxu0 %vm230_vm2, %v2186_v47  ;;  %v789_v47 = vld [vmem:[#allocation2 + $0x8] sm:$0xff] }
 0x1fe   :  { %2424 = vmatprep.mubr.msk.f32.mxu0 %vm2707_vm0, %v2708_v1 }
 0x201   :  { %2425 = vmatmul.mubr.msk.f32.gmra.mrb[18].mxu0 %vm230_vm2, %v2187_v48  ;;  %v788_v48 = vld [vmem:[#allocation2] sm:$0xff] }
 0x202   :  { %2462 = vmatprep.mubr.msk.f32.mxu0 %vm2707_vm0, %v2708_v1 }
 0x2c4   :  { %v459_v49 = vpop.f32.mrb[10].mxu0 }
 0x2c5   :  { %v2414_v50 = vpop.f32.mrb[11].mxu0  ;;  %v460_v52 = vadd.f32 %v459_v49, %v356_v51  ;;  %v791_v49 = vld [vmem:[#allocation2 + $0x18] sm:$0xff] }
 0x2c6   :  { %v650_v50 = vpop.permute.xlu1 %649 }
 0x2c7   :  { %v483_v57 = vmax.f32 %v460_v52, 0.0 }
 0x2c8   :  { %v464_v54 = vpop.f32.mrb[12].mxu0 }
 0x2c9   :  { %v465_v55 = vadd.f32 %v464_v54, %v361_v53  ;;  %v2417_v56 = vpop.f32.mrb[13].mxu0  ;;  %v790_v54 = vld [vmem:[#allocation2 + $0x10] sm:$0xff] }
 0x2cb   :  { %v484_v58 = vmax.f32 %v465_v55, 0.0  ;;  %v655_v55 = vpop.permute.xlu0 %654 }
 0x2cc   :  { %v469_v59 = vpop.f32.mrb[14].mxu0 }
 0x2cd   :  { %v2493_v60 = vpack.c.bf16 %v484_v58, %v483_v57  ;;  %v2420_v61 = vpop.f32.mrb[15].mxu0  ;;  %v470_v63 = vadd.f32 %v469_v59, %v366_v62 }
 0x2cf   :  { %2494 = vmatpush3.bf16.msra.mxu1 %v2493_v60  ;;  %v485_v6 = vmax.f32 %v470_v63, 0.0 }
 0x2d0   :  { %v474_v3 = vpop.f32.mrb[16].mxu0  ;;  %2495 = vmatprep.subr.bf16.mxu1 %v2706_v0 }
 0x2d1   :  { %v475_v4 = vadd.f32 %v474_v3, %v371_v2  ;;  %v2423_v5 = vpop.f32.mrb[17].mxu0 }
 0x2d3   :  { %v486_v7 = vmax.f32 %v475_v4, 0.0 }
 0x2d4   :  { %v479_v9 = vpop.f32.mrb[18].mxu0 }
 0x2d5   :  { %v2496_v10 = vpack.c.bf16 %v486_v7, %v485_v6  ;;  %v480_v11 = vadd.f32 %v479_v9, %v376_v8  ;;  %v2426_v12 = vpop.f32.mrb[19].mxu0  ;;  %v2215_v7 = vld [vmem:[%s3254_s3 + $0xb0] sm:$0xff]  ;;  %v2216_v8 = vld [vmem:[%s3254_s3 + $0xb8] sm:$0xff]  ;;  %v2217_v9 = vld [vmem:[%s3254_s3 + $0xc0] sm:$0xff] }
 0x2d6   :  { %v952_v12 = vld [vmem:[%s3252_s1] sm:$0xff] }
 0x2d7   :  { %2497 = vmatpush3.bf16.msra.mxu1 %v2496_v10  ;;  %v487_v13 = vmax.f32 %v480_v11, 0.0 }
 0x2d8   :  { %2435 = vmatprep.subr.mxu1 %v2708_v1 }
 0x2db   :  { %2436 = vmatpush3.msra.mxu1 %v487_v13  ;;  %v953_v13 = vld [vmem:[%s3252_s1 + $0x8] sm:$0xff] }
 0x2dc   :  { %2438 = vmatmul.mubr.msk.f32.vlgmr.msra.gmra.mrb[10].mxu1 %vm230_vm2, %v2198_v14  ;;  %798 = vmatprep.subr.mxu1 %v789_v47 }
 0x2dd   :  { %2440 = vmatprep.mubr.msk.f32.mxu1 %vm2707_vm0, %v2708_v1  ;;  %799 = vmatpush1.msra.mxu1 %v788_v48 }
 0x2de   :  { %875 = vmatprep.subr.mxu1 %v791_v49 }
 0x2e0   :  { %2441 = vmatmul.mubr.msk.f32.gmra.mrb[12].mxu1 %vm230_vm2, %v2199_v15 }
 0x2e1   :  { %2443 = vmatprep.mubr.msk.f32.mxu1 %vm2707_vm0, %v2708_v1 }
 0x2e4   :  { %2444 = vmatmul.mubr.msk.f32.gmra.mrb[14].mxu1 %vm230_vm2, %v2200_v16 }
 0x2e5   :  { %2446 = vmatprep.mubr.msk.f32.mxu1 %vm2707_vm0, %v2708_v1 }
 0x2e8   :  { %2447 = vmatmul.mubr.msk.f32.gmra.mrb[16].mxu1 %vm230_vm2, %v2201_v17 }
 0x2e9   :  { %2449 = vmatprep.mubr.msk.f32.mxu1 %vm2707_vm0, %v2708_v1 }
 0x2ec   :  { %2450 = vmatmul.mubr.msk.f32.gmra.mrb[18].mxu1 %vm230_vm2, %v2202_v18 }
 0x2ed   :  { %862 = vmatprep.mubr.f32.mxu1 %v2708_v1 }
 0x3af   :  { %v606_v19 = vpop.f32.mrb[10].mxu1 }
 0x3b0   :  { %v2439_v20 = vpop.f32.mrb[11].mxu1  ;;  %v607_v22 = vadd.f32 %v606_v19, %v503_v21 }
 0x3b2   :  { %v630_v27 = vmax.f32 %v607_v22, 0.0  ;;  %v968_v22 = vld [vmem:[%s3256_s5] sm:$0xff] }
 0x3b3   :  { %v611_v24 = vpop.f32.mrb[12].mxu1 }
 0x3b4   :  { %v612_v25 = vadd.f32 %v611_v24, %v508_v23  ;;  %v2442_v26 = vpop.f32.mrb[13].mxu1  ;;  %v954_v23 = vld [vmem:[%s3252_s1 + $0x10] sm:$0xff]  ;;  %v955_v24 = vld [vmem:[%s3252_s1 + $0x18] sm:$0xff]  ;;  %s2710_s1 = smov [#allocation6]  }
 0x3b5   :  { %s2121_s24 = sshll.u32 %s2710_s1, 4  ;;  %s2122_s24 = int_to_ptr.vmem [resolvable:$true] %s2121_s24 }
 0x3b6   :  { %v631_v28 = vmax.f32 %v612_v25, 0.0  ;;  %p2614_p9 = scmp.lt.s32.totalorder %s2122_s24, %s2122_s24 }
 0x3b7   :  { %v616_v29 = vpop.f32.mrb[14].mxu1 }
 0x3b8   :  { %v2499_v30 = vpack.c.bf16 %v631_v28, %v630_v27  ;;  %v2445_v31 = vpop.f32.mrb[15].mxu1  ;;  %v617_v33 = vadd.f32 %v616_v29, %v513_v32  ;;  %v969_v28 = vld [vmem:[%s3256_s5 + $0x8] sm:$0xff]  ;;  %v970_v32 = vld [vmem:[%s3256_s5 + $0x10] sm:$0xf] }
 0x3ba   :  { %2500 = vmatpush3.bf16.msra.mxu0 %v2499_v30  ;;  %v632_v38 = vmax.f32 %v617_v33, 0.0 }
 0x3bb   :  { %v621_v35 = vpop.f32.mrb[16].mxu1  ;;  %2501 = vmatprep.subr.bf16.mxu0 %v2706_v0  ;;  %v2214_v0 = vld [vmem:[%s3254_s3 + $0xa8] sm:$0xff] }
 0x3bc   :  { %v622_v36 = vadd.f32 %v621_v35, %v518_v34  ;;  %v2448_v37 = vpop.f32.mrb[17].mxu1 }
 0x3be   :  { %v633_v39 = vmax.f32 %v622_v36, 0.0 }
 0x3bf   :  { %v626_v41 = vpop.f32.mrb[18].mxu1 }
 0x3c0   :  { %v2502_v42 = vpack.c.bf16 %v633_v39, %v632_v38  ;;  %v627_v43 = vadd.f32 %v626_v41, %v523_v40  ;;  %v2451_v44 = vpop.f32.mrb[19].mxu1  ;;  %v977_v40 = vpop.permute.xlu0 %976 }
 0x3c2   :  { %2503 = vmatpush3.bf16.msra.mxu0 %v2502_v42  ;;  %v634_v45 = vmax.f32 %v627_v43, 0.0  ;;  %v982_v43 = vpop.permute.xlu1 %981 }
 0x3c3   :  { %2460 = vmatprep.subr.mxu0 %v2708_v1 }
 0x3c4   :  { %v987_v48 = vpop.permute.xlu0 %986 }
 0x3c6   :  { %2461 = vmatpush3.msra.mxu0 %v634_v45 }
 0x3c7   :  { %2463 = vmatmul.mubr.msk.f32.vlgmr.msra.gmra.mrb[20].mxu0 %vm230_vm2, %v2213_v46 }
 0x3c8   :  { %2465 = vmatprep.mubr.msk.f32.mxu0 %vm2707_vm0, %v2708_v1 }
 0x3cb   :  { %2466 = vmatmul.mubr.msk.f32.gmra.mrb[22].mxu0 %vm230_vm2, %v2214_v0 }
 0x3cc   :  { %2468 = vmatprep.mubr.msk.f32.mxu0 %vm2707_vm0, %v2708_v1 }
 0x3cf   :  { %2469 = vmatmul.mubr.msk.f32.gmra.mrb[24].mxu0 %vm230_vm2, %v2215_v7 }
 0x3d0   :  { %2471 = vmatprep.mubr.msk.f32.mxu0 %vm2707_vm0, %v2708_v1 }
 0x3d3   :  { %2472 = vmatmul.mubr.msk.f32.gmra.mrb[26].mxu0 %vm230_vm2, %v2216_v8 }
 0x3d4   :  { %2474 = vmatprep.mubr.msk.f32.mxu0 %vm2707_vm0, %v2708_v1 }
 0x3d7   :  { %2475 = vmatmul.mubr.msk.f32.gmra.mrb[28].mxu0 %vm230_vm2, %v2217_v9  ;;  %v2239_v9 = vld [vmem:[%s3256_s5 + $0x18] sm:$0xff] }
 0x3d8   :  { %1062 = vmatprep.mubr.f32.mxu0 %v2708_v1 }
 0x49a   :  { %v750_v51 = vpop.f32.mrb[20].mxu0 }
 0x49b   :  { %v751_v52 = vadd.f32 %v750_v51, %v650_v50  ;;  %v2464_v53 = vpop.f32.mrb[21].mxu0 }
 0x49d   :  { %2229 = vmatmul.mubr.msk.f32.vlgmr.msra.gmra.mrb[20].mxu1 %vm778_vm3, %v751_v52  ;;  %779 = vst.msk [vmem:[#allocation5] sm:$0xff] %vm778_vm3, %v751_v52 }
 0x49e   :  { %v755_v56 = vpop.f32.mrb[22].mxu0  ;;  %868 = vmatprep.mubr.f32.mxu1 %v2708_v1  ;;  %876 = vmatpush1.msra.mxu1 %v790_v54 }
 0x49f   :  { %v756_v57 = vadd.f32 %v755_v56, %v655_v55  ;;  %v2467_v58 = vpop.f32.mrb[23].mxu0 }
 0x4a1   :  { %v2228_v59 = vmul.f32 -1.442695, %v756_v57 }
 0x4a2   :  { %v760_v33 = vpop.f32.mrb[24].mxu0 }
 0x4a3   :  { %2549 = vpow2.f32 %v2228_v59  ;;  %v2470_v34 = vpop.f32.mrb[25].mxu0 }
 0x4a6   :  { %v764_v35 = vpop.f32.mrb[26].mxu0 }
 0x4a7   :  { %v2473_v36 = vpop.f32.mrb[27].mxu0 }
 0x4aa   :  { %v768_v37 = vpop.f32.mrb[28].mxu0 }
 0x4ab   :  { %v2476_v38 = vpop.f32.mrb[29].mxu0 }
 0x4ad   :  { %v2550_v60 = vpop.eup %2549 }
 0x4ae   :  { %v774_v61 = vadd.f32 1.0, %v2550_v60 }
 0x4b0   :  { %2551 = vrcp.f32 %v774_v61 }
 0x4ba   :  { %v2552_v62 = vpop.eup %2551 }
 0x4bb   :  { %v777_v63 = vadd.f32 0.05, %v2552_v62 }
 0x4bd   :  { %780 = vst.msk [vmem:[#allocation6] sm:$0xff] %vm778_vm3, %v777_v63  ;;  %2553 = vrsqrt.f32 %v777_v63  ;;  %vm783_vm4 = vcmp.eq.f32.partialorder %v777_v63, inf  ;;  %v786_v4 = vand.u32 2147483648, %v777_v63  ;;  %vm785_vm5 = vcmp.eq.f32.partialorder %v777_v63, 0.0 }
 0x4c7   :  { %v2554_v2 = vpop.eup %2553 }
 0x4c8   :  { %v782_v3 = vmul.f32 %v2554_v2, %v777_v63 }
 0x4ca   :  { %v784_v5 = vsel %vm783_vm4, %v777_v63, %v782_v3 }
 0x4cb   :  { %v787_v6 = vsel %vm785_vm5, %v786_v4, %v784_v5 }
 0x4cc   :  { %2230 = vmatmul.mubr.msk.f32.gmra.mrb[22].mxu1 %vm778_vm3, %v787_v6 }
 0x4cd   :  { %939 = vmatprep.mubr.f32.mxu1 %v2708_v1 }
 0x4d0   :  { %2231 = vmatmul.mubr.msk.f32.vlgmr.msra.gmra.mrb[24].mxu1 %vm778_vm3, %v751_v52 }
 0x4d1   :  { %945 = vmatprep.mubr.f32.mxu1 %v2708_v1 }
 0x4d4   :  { %2232 = vmatmul.mubr.msk.f32.gmra.mrb[26].mxu1 %vm778_vm3, %v787_v6 }
 0x4d5   :  { %1145 = vmatprep.mubr.f32.mxu1 %v2708_v1 }
 0x570   :  { %v864_v10 = vpop.f32.mrb[20].mxu1 }
 0x571   :  { %v866_v11 = vpop.f32.mrb[21].mxu1 }
 0x59f   :  { %v870_v14 = vpop.f32.mrb[22].mxu1 }
 0x5a0   :  { %v956_v15 = vmul.f32 %v952_v12, %v870_v14  ;;  %v872_v16 = vpop.f32.mrb[23].mxu1 }
 0x5a1   :  { %v957_v17 = vmul.f32 %v953_v13, %v872_v16 }
 0x5a2   :  { %v960_v18 = vadd.f32 %v956_v15, %v864_v10 }
 0x5a3   :  { %v961_v19 = vadd.f32 %v957_v17, %v866_v11  ;;  %v941_v20 = vpop.f32.mrb[24].mxu1 }
 0x5a4   :  { %964 = vst [vmem:[#allocation8] sm:$0xff] %v960_v18  ;;  %v943_v21 = vpop.f32.mrb[25].mxu1 }
 0x5a5   :  { %965 = vst [vmem:[#allocation8 + $0x8] sm:$0xff] %v961_v19  ;;  %998 = vmatprep.subr.mxu0 %v961_v19 }
 0x5a6   :  { %999 = vmatpush1.msra.mxu0 %v960_v18  ;;  %v2240_v18 = vld [vmem:[%s3256_s5 + $0x20] sm:$0xff] }
 0x5a7   :  { %v947_v25 = vpop.f32.mrb[26].mxu1  ;;  %2233 = vmatmul.mubr.msk.f32.vlgmr.msra.gmra.mrb[30].mxu0 %vm778_vm3, %v968_v22 }
 0x5a8   :  { %v958_v26 = vmul.f32 %v954_v23, %v947_v25  ;;  %v949_v27 = vpop.f32.mrb[27].mxu1  ;;  %1068 = vmatprep.mubr.f32.mxu0 %v2708_v1  ;;  %v1187_v23 = vpop.permute.xlu1 %1186 }
 0x5a9   :  { %v959_v29 = vmul.f32 %v955_v24, %v949_v27 }
 0x5aa   :  { %v962_v30 = vadd.f32 %v958_v26, %v941_v20  ;;  %v1192_v26 = vpop.permute.xlu0 %1191 }
 0x5ab   :  { %v963_v31 = vadd.f32 %v959_v29, %v943_v21  ;;  %2234 = vmatmul.mubr.msk.f32.gmra.mrb[32].mxu0 %vm778_vm3, %v969_v28  ;;  %v2241_v21 = vld [vmem:[%s3256_s5 + $0x28] sm:$0xf] }
 0x5ac   :  { %966 = vst [vmem:[#allocation8 + $0x10] sm:$0xff] %v962_v30  ;;  %1074 = vmatprep.mubr.f32.mxu0 %v2708_v1 }
 0x5ad   :  { %967 = vst [vmem:[#allocation8 + $0x18] sm:$0xff] %v963_v31  ;;  %1081 = vmatprep.subr.mxu1 %v963_v31 }
 0x5ae   :  { %1082 = vmatpush1.msra.mxu1 %v962_v30 }
 0x5af   :  { %2235 = vmatmul.mubr.msk.f32.gmra.mrb[34].mxu0 %vm778_vm3, %v970_v32  ;;  %2236 = vmatmul.mubr.msk.f32.vlgmr.msra.gmra.mrb[28].mxu1 %vm778_vm3, %v968_v22 }
 0x5b0   :  { %1151 = vmatprep.mubr.f32.mxu1 %v2708_v1  ;;  %1286 = vmatprep.mubr.f32.mxu0 %v2708_v1 }
 0x5b3   :  { %2237 = vmatmul.mubr.msk.f32.gmra.mrb[30].mxu1 %vm778_vm3, %v969_v28 }
 0x5b4   :  { %1157 = vmatprep.mubr.f32.mxu1 %v2708_v1 }
 0x5b7   :  { %2238 = vmatmul.mubr.msk.f32.gmra.mrb[32].mxu1 %vm778_vm3, %v970_v32  ;;  %v1197_v32 = vpop.permute.xlu1 %1196 }
 0x5b8   :  { %1369 = vmatprep.mubr.f32.mxu1 %v2708_v1 }
 0x67a   :  { %v1064_v39 = vpop.f32.mrb[30].mxu0 }
 0x67b   :  { %v1066_v41 = vpop.f32.mrb[31].mxu0  ;;  %v1065_v42 = vadd.f32 %v1064_v39, %v977_v40 }
 0x67c   :  { %v1067_v44 = vadd.f32 %v1066_v41, %v977_v40 }
 0x67d   :  { %v1164_v49 = vmax.f32 %v1065_v42, 0.0 }
 0x67e   :  { %v1070_v45 = vpop.f32.mrb[32].mxu0  ;;  %v1165_v51 = vmax.f32 %v1067_v44, 0.0 }
 0x67f   :  { %v1071_v46 = vadd.f32 %v1070_v45, %v982_v43  ;;  %v1072_v0 = vpop.f32.mrb[33].mxu0 }
 0x680   :  { %v1073_v47 = vadd.f32 %v1072_v0, %v982_v43 }
 0x681   :  { %v1168_v50 = vmax.f32 %v1071_v46, 0.0 }
 0x682   :  { %v1169_v52 = vmax.f32 %v1073_v47, 0.0  ;;  %v1076_v53 = vpop.f32.mrb[34].mxu0  ;;  %v1147_v54 = vpop.f32.mrb[28].mxu1 }
 0x683   :  { %v2506_v55 = vpack.c.bf16 %v1168_v50, %v1164_v49  ;;  %v1078_v56 = vpop.f32.mrb[35].mxu0  ;;  %v1149_v57 = vpop.f32.mrb[29].mxu1  ;;  %v1077_v60 = vadd.f32 %v1076_v53, %v987_v48  ;;  %v1148_v61 = vadd.f32 %v1147_v54, %v977_v40  ;;  %v2255_v54 = vld [vmem:[%s3256_s5 + $0x30] sm:$0xff] }
 0x684   :  { %v2504_v58 = vpack.c.bf16 %v1169_v52, %v1165_v51  ;;  %v1079_v59 = vadd.f32 %v1078_v56, %v987_v48  ;;  %v1150_v63 = vadd.f32 %v1149_v57, %v977_v40 }
 0x685   :  { %v1172_v6 = vmax.f32 %v1077_v60, 0.0  ;;  %v1166_v7 = vmax.f32 %v1148_v61, 0.0 }
 0x686   :  { %v1173_v62 = vmax.f32 %v1079_v59, 0.0  ;;  %v1153_v2 = vpop.f32.mrb[30].mxu1  ;;  %2505 = vmatprep.subr.bf16.mxu0 %v2504_v58  ;;  %v1167_v10 = vmax.f32 %v1150_v63, 0.0  ;;  %v2256_v63 = vld [vmem:[%s3256_s5 + $0x38] sm:$0xff] }
 0x687   :  { %v1154_v3 = vadd.f32 %v1153_v2, %v982_v43  ;;  %v1155_v4 = vpop.f32.mrb[31].mxu1  ;;  %2507 = vmatpush1.bf16.msra.mxu0 %v2506_v55 }
 0x688   :  { %v1156_v5 = vadd.f32 %v1155_v4, %v982_v43  ;;  %2245 = vmatprep.subr.msk.mxu0 %vm1209_vm6, %v1173_v62  ;;  %v2257_v4 = vld [vmem:[%s3256_s5 + $0x40] sm:$0xf] }
 0x689   :  { %v1170_v8 = vmax.f32 %v1154_v3, 0.0 }
 0x68a   :  { %v1171_v11 = vmax.f32 %v1156_v5, 0.0  ;;  %v1159_v12 = vpop.f32.mrb[32].mxu1 }
 0x68b   :  { %v2510_v13 = vpack.c.bf16 %v1170_v8, %v1166_v7  ;;  %v1161_v14 = vpop.f32.mrb[33].mxu1  ;;  %2246 = vmatpush1.msk.msra.mxu0 %vm1209_vm6, %v1172_v6  ;;  %v1160_v17 = vadd.f32 %v1159_v12, %v987_v48  ;;  %v1411_v6 = vpop.permute.xlu0 %1410 }
 0x68c   :  { %v2508_v15 = vpack.c.bf16 %v1171_v11, %v1167_v10  ;;  %v1162_v16 = vadd.f32 %v1161_v14, %v987_v48  ;;  %2247 = vmatmul.mubr.msk.f32.vlgmr.msra.gmra.mrb[36].mxu0 %vm1199_vm7, %v2239_v9 }
 0x68d   :  { %1292 = vmatprep.mubr.f32.mxu0 %v2708_v1  ;;  %v1174_v20 = vmax.f32 %v1160_v17, 0.0 }
 0x68e   :  { %v1175_v19 = vmax.f32 %v1162_v16, 0.0  ;;  %2509 = vmatprep.subr.bf16.mxu1 %v2508_v15 }
 0x68f   :  { %2511 = vmatpush1.bf16.msra.mxu1 %v2510_v13  ;;  %v1421_v15 = vpop.permute.xlu0 %1420 }
 0x690   :  { %2248 = vmatmul.mubr.msk.f32.gmra.mrb[38].mxu0 %vm1199_vm7, %v2240_v18  ;;  %2250 = vmatprep.subr.msk.mxu1 %vm1209_vm6, %v1175_v19 }
 0x691   :  { %1298 = vmatprep.mubr.f32.mxu0 %v2708_v1 }
 0x693   :  { %2251 = vmatpush1.msk.msra.mxu1 %vm1209_vm6, %v1174_v20 }
 0x694   :  { %2249 = vmatmul.mubr.msk.f32.gmra.mrb[40].mxu0 %vm1199_vm7, %v2241_v21  ;;  %2252 = vmatmul.mubr.msk.f32.vlgmr.msra.gmra.mrb[34].mxu1 %vm1199_vm7, %v2239_v9  ;;  %v1416_v9 = vpop.permute.xlu1 %1415 }
 0x695   :  { %1375 = vmatprep.mubr.f32.mxu1 %v2708_v1  ;;  %1508 = vmatprep.mubr.f32.mxu0 %v2708_v1 }
 0x698   :  { %2253 = vmatmul.mubr.msk.f32.gmra.mrb[36].mxu1 %vm1199_vm7, %v2240_v18 }
 0x699   :  { %1381 = vmatprep.mubr.f32.mxu1 %v2708_v1 }
 0x69c   :  { %2254 = vmatmul.mubr.msk.f32.gmra.mrb[38].mxu1 %vm1199_vm7, %v2241_v21 }
 0x69d   :  { %1591 = vmatprep.mubr.f32.mxu1 %v2708_v1 }
 0x75f   :  { %v1288_v22 = vpop.f32.mrb[36].mxu0 }
 0x760   :  { %v1290_v24 = vpop.f32.mrb[37].mxu0  ;;  %v1289_v25 = vadd.f32 %v1288_v22, %v1187_v23 }
 0x761   :  { %v1291_v27 = vadd.f32 %v1290_v24, %v1187_v23 }
 0x762   :  { %v1388_v33 = vmax.f32 %v1289_v25, 0.0 }
 0x763   :  { %v1294_v28 = vpop.f32.mrb[38].mxu0  ;;  %v1389_v35 = vmax.f32 %v1291_v27, 0.0 }
 0x764   :  { %v1295_v29 = vadd.f32 %v1294_v28, %v1192_v26  ;;  %v1296_v30 = vpop.f32.mrb[39].mxu0 }
 0x765   :  { %v1297_v31 = vadd.f32 %v1296_v30, %v1192_v26 }
 0x766   :  { %v1392_v34 = vmax.f32 %v1295_v29, 0.0 }
 0x767   :  { %v1393_v36 = vmax.f32 %v1297_v31, 0.0  ;;  %v1300_v37 = vpop.f32.mrb[40].mxu0  ;;  %v1371_v38 = vpop.f32.mrb[34].mxu1 }
 0x768   :  { %v2514_v39 = vpack.c.bf16 %v1392_v34, %v1388_v33  ;;  %v1302_v40 = vpop.f32.mrb[41].mxu0  ;;  %v1373_v41 = vpop.f32.mrb[35].mxu1  ;;  %v1301_v44 = vadd.f32 %v1300_v37, %v1197_v32  ;;  %v1372_v45 = vadd.f32 %v1371_v38, %v1187_v23  ;;  %v2271_v38 = vld [vmem:[%s3256_s5 + $0x48] sm:$0xff] }
 0x769   :  { %v2512_v42 = vpack.c.bf16 %v1393_v36, %v1389_v35  ;;  %v1303_v43 = vadd.f32 %v1302_v40, %v1197_v32  ;;  %v1374_v0 = vadd.f32 %v1373_v41, %v1187_v23 }
 0x76a   :  { %v1396_v51 = vmax.f32 %v1301_v44, 0.0  ;;  %v1390_v52 = vmax.f32 %v1372_v45, 0.0 }
 0x76b   :  { %v1397_v46 = vmax.f32 %v1303_v43, 0.0  ;;  %v1377_v47 = vpop.f32.mrb[36].mxu1  ;;  %2513 = vmatprep.subr.bf16.mxu0 %v2512_v42  ;;  %v1391_v55 = vmax.f32 %v1374_v0, 0.0  ;;  %v2272_v0 = vld [vmem:[%s3256_s5 + $0x50] sm:$0xff] }
 0x76c   :  { %v1378_v48 = vadd.f32 %v1377_v47, %v1192_v26  ;;  %v1379_v49 = vpop.f32.mrb[37].mxu1  ;;  %2515 = vmatpush1.bf16.msra.mxu0 %v2514_v39 }
 0x76d   :  { %v1380_v50 = vadd.f32 %v1379_v49, %v1192_v26  ;;  %2261 = vmatprep.subr.msk.mxu0 %vm1209_vm6, %v1397_v46  ;;  %v2273_v49 = vld [vmem:[%s3256_s5 + $0x58] sm:$0xf] }
 0x76e   :  { %v1394_v53 = vmax.f32 %v1378_v48, 0.0 }
 0x76f   :  { %v1395_v56 = vmax.f32 %v1380_v50, 0.0  ;;  %v1383_v57 = vpop.f32.mrb[38].mxu1 }
 0x770   :  { %v2518_v58 = vpack.c.bf16 %v1394_v53, %v1390_v52  ;;  %v1385_v59 = vpop.f32.mrb[39].mxu1  ;;  %2262 = vmatpush1.msk.msra.mxu0 %vm1209_vm6, %v1396_v51  ;;  %v1384_v62 = vadd.f32 %v1383_v57, %v1197_v32  ;;  %v1633_v51 = vpop.permute.xlu1 %1632 }
 0x771   :  { %v2516_v60 = vpack.c.bf16 %v1395_v56, %v1391_v55  ;;  %v1386_v61 = vadd.f32 %v1385_v59, %v1197_v32  ;;  %2263 = vmatmul.mubr.msk.f32.vlgmr.msra.gmra.mrb[42].mxu0 %vm1199_vm7, %v2255_v54 }
 0x772   :  { %1514 = vmatprep.mubr.f32.mxu0 %v2708_v1  ;;  %v1398_v3 = vmax.f32 %v1384_v62, 0.0 }
 0x773   :  { %v1399_v2 = vmax.f32 %v1386_v61, 0.0  ;;  %2517 = vmatprep.subr.bf16.mxu1 %v2516_v60 }
 0x774   :  { %2519 = vmatpush1.bf16.msra.mxu1 %v2518_v58  ;;  %v1643_v60 = vpop.permute.xlu1 %1642 }
 0x775   :  { %2264 = vmatmul.mubr.msk.f32.gmra.mrb[44].mxu0 %vm1199_vm7, %v2256_v63  ;;  %2266 = vmatprep.subr.msk.mxu1 %vm1209_vm6, %v1399_v2 }
 0x776   :  { %1520 = vmatprep.mubr.f32.mxu0 %v2708_v1 }
 0x778   :  { %2267 = vmatpush1.msk.msra.mxu1 %vm1209_vm6, %v1398_v3 }
 0x779   :  { %2265 = vmatmul.mubr.msk.f32.gmra.mrb[46].mxu0 %vm1199_vm7, %v2257_v4  ;;  %2268 = vmatmul.mubr.msk.f32.vlgmr.msra.gmra.mrb[40].mxu1 %vm1199_vm7, %v2255_v54  ;;  %v1638_v54 = vpop.permute.xlu0 %1637 }
 0x77a   :  { %1597 = vmatprep.mubr.f32.mxu1 %v2708_v1  ;;  %1730 = vmatprep.mubr.f32.mxu0 %v2708_v1 }
 0x77d   :  { %2269 = vmatmul.mubr.msk.f32.gmra.mrb[42].mxu1 %vm1199_vm7, %v2256_v63 }
 0x77e   :  { %1603 = vmatprep.mubr.f32.mxu1 %v2708_v1 }
 0x781   :  { %2270 = vmatmul.mubr.msk.f32.gmra.mrb[44].mxu1 %vm1199_vm7, %v2257_v4 }
 0x782   :  { %1813 = vmatprep.mubr.f32.mxu1 %v2708_v1 }
 0x844   :  { %v1510_v5 = vpop.f32.mrb[42].mxu0 }
 0x845   :  { %v1512_v7 = vpop.f32.mrb[43].mxu0  ;;  %v1511_v8 = vadd.f32 %v1510_v5, %v1411_v6 }
 0x846   :  { %v1513_v10 = vadd.f32 %v1512_v7, %v1411_v6 }
 0x847   :  { %v1610_v16 = vmax.f32 %v1511_v8, 0.0 }
 0x848   :  { %v1516_v11 = vpop.f32.mrb[44].mxu0  ;;  %v1611_v18 = vmax.f32 %v1513_v10, 0.0 }
 0x849   :  { %v1517_v12 = vadd.f32 %v1516_v11, %v1416_v9  ;;  %v1518_v13 = vpop.f32.mrb[45].mxu0 }
 0x84a   :  { %v1519_v14 = vadd.f32 %v1518_v13, %v1416_v9 }
 0x84b   :  { %v1614_v17 = vmax.f32 %v1517_v12, 0.0 }
 0x84c   :  { %v1615_v19 = vmax.f32 %v1519_v14, 0.0  ;;  %v1522_v20 = vpop.f32.mrb[46].mxu0  ;;  %v1593_v21 = vpop.f32.mrb[40].mxu1 }
 0x84d   :  { %v2522_v22 = vpack.c.bf16 %v1614_v17, %v1610_v16  ;;  %v1524_v23 = vpop.f32.mrb[47].mxu0  ;;  %v1595_v24 = vpop.f32.mrb[41].mxu1  ;;  %v1523_v27 = vadd.f32 %v1522_v20, %v1421_v15  ;;  %v1594_v28 = vadd.f32 %v1593_v21, %v1411_v6  ;;  %v2287_v21 = vld [vmem:[%s3256_s5 + $0x60] sm:$0xff] }
 0x84e   :  { %v2520_v25 = vpack.c.bf16 %v1615_v19, %v1611_v18  ;;  %v1525_v26 = vadd.f32 %v1524_v23, %v1421_v15  ;;  %v1596_v30 = vadd.f32 %v1595_v24, %v1411_v6 }
 0x84f   :  { %v1618_v35 = vmax.f32 %v1523_v27, 0.0  ;;  %v1612_v36 = vmax.f32 %v1594_v28, 0.0 }
 0x850   :  { %v1619_v29 = vmax.f32 %v1525_v26, 0.0  ;;  %v1599_v31 = vpop.f32.mrb[42].mxu1  ;;  %2521 = vmatprep.subr.bf16.mxu0 %v2520_v25  ;;  %v1613_v39 = vmax.f32 %v1596_v30, 0.0  ;;  %v2288_v30 = vld [vmem:[%s3256_s5 + $0x68] sm:$0xff] }
 0x851   :  { %v1600_v32 = vadd.f32 %v1599_v31, %v1416_v9  ;;  %v1601_v33 = vpop.f32.mrb[43].mxu1  ;;  %2523 = vmatpush1.bf16.msra.mxu0 %v2522_v22 }
 0x852   :  { %v1602_v34 = vadd.f32 %v1601_v33, %v1416_v9  ;;  %2277 = vmatprep.subr.msk.mxu0 %vm1209_vm6, %v1619_v29  ;;  %v2289_v33 = vld [vmem:[%s3256_s5 + $0x70] sm:$0xf]  ;;  %s2609_s5 = scalar_lea.vmem %s2122_s24, 128 }
 0x853   :  { %v1616_v37 = vmax.f32 %v1600_v32, 0.0  ;;  %p2610_p8 = scmp.ne.s32.totalorder %s2122_s24, %s2609_s5  ;;  %p2615_p10 = scmp.lt.s32.totalorder %s2609_s5, %s2609_s5 }
 0x854   :  { %v1617_v40 = vmax.f32 %v1602_v34, 0.0  ;;  %v1605_v41 = vpop.f32.mrb[44].mxu1 }
 0x855   :  { %v2526_v42 = vpack.c.bf16 %v1616_v37, %v1612_v36  ;;  %v1607_v43 = vpop.f32.mrb[45].mxu1  ;;  %2278 = vmatpush1.msk.msra.mxu0 %vm1209_vm6, %v1618_v35  ;;  %v1606_v46 = vadd.f32 %v1605_v41, %v1421_v15  ;;  %p2616_p11 = por %p2615_p10, %p2614_p9 }
 0x856   :  { %v2524_v44 = vpack.c.bf16 %v1617_v40, %v1613_v39  ;;  %v1608_v45 = vadd.f32 %v1607_v43, %v1421_v15  ;;  %2279 = vmatmul.mubr.msk.f32.vlgmr.msra.gmra.mrb[48].mxu0 %vm1199_vm7, %v2271_v38 }
 0x857   :  { %1736 = vmatprep.mubr.f32.mxu0 %v2708_v1  ;;  %v1620_v48 = vmax.f32 %v1606_v46, 0.0  ;;  %p2617_p12 = pnand %p2616_p11, %p2610_p8 }
 0x858   :  { %v1621_v47 = vmax.f32 %v1608_v45, 0.0  ;;  %2525 = vmatprep.subr.bf16.mxu1 %v2524_v44 }
 0x859   :  { %2527 = vmatpush1.bf16.msra.mxu1 %v2526_v42 }
 0x85a   :  { %2280 = vmatmul.mubr.msk.f32.gmra.mrb[50].mxu0 %vm1199_vm7, %v2272_v0  ;;  %2282 = vmatprep.subr.msk.mxu1 %vm1209_vm6, %v1621_v47 }
 0x85b   :  { %1742 = vmatprep.mubr.f32.mxu0 %v2708_v1 }
 0x85d   :  { %2283 = vmatpush1.msk.msra.mxu1 %vm1209_vm6, %v1620_v48 }
 0x85e   :  { %2281 = vmatmul.mubr.msk.f32.gmra.mrb[52].mxu0 %vm1199_vm7, %v2273_v49  ;;  %2284 = vmatmul.mubr.msk.f32.vlgmr.msra.gmra.mrb[46].mxu1 %vm1199_vm7, %v2271_v38 }
 0x85f   :  { %1819 = vmatprep.mubr.f32.mxu1 %v2708_v1  ;;  %1951 = vmatprep.mubr.f32.mxu0 %v2708_v1 }
 0x862   :  { %2285 = vmatmul.mubr.msk.f32.gmra.mrb[48].mxu1 %vm1199_vm7, %v2272_v0 }
 0x863   :  { %1825 = vmatprep.mubr.f32.mxu1 %v2708_v1 }
 0x866   :  { %2286 = vmatmul.mubr.msk.f32.gmra.mrb[50].mxu1 %vm1199_vm7, %v2273_v49 }
 0x867   :  { %2032 = vmatprep.mubr.f32.mxu1 %v2708_v1 }
 0x929   :  { %v1732_v50 = vpop.f32.mrb[48].mxu0 }
 0x92a   :  { %v1734_v52 = vpop.f32.mrb[49].mxu0  ;;  %v1733_v53 = vadd.f32 %v1732_v50, %v1633_v51 }
 0x92b   :  { %v1735_v55 = vadd.f32 %v1734_v52, %v1633_v51 }
 0x92c   :  { %v1832_v61 = vmax.f32 %v1733_v53, 0.0 }
 0x92d   :  { %v1738_v56 = vpop.f32.mrb[50].mxu0  ;;  %v1833_v63 = vmax.f32 %v1735_v55, 0.0 }
 0x92e   :  { %v1739_v57 = vadd.f32 %v1738_v56, %v1638_v54  ;;  %v1740_v58 = vpop.f32.mrb[51].mxu0 }
 0x92f   :  { %v1741_v59 = vadd.f32 %v1740_v58, %v1638_v54 }
 0x930   :  { %v1836_v62 = vmax.f32 %v1739_v57, 0.0 }
 0x931   :  { %v1837_v2 = vmax.f32 %v1741_v59, 0.0  ;;  %v1744_v3 = vpop.f32.mrb[52].mxu0  ;;  %v1815_v4 = vpop.f32.mrb[46].mxu1 }
 0x932   :  { %v2530_v5 = vpack.c.bf16 %v1836_v62, %v1832_v61  ;;  %v1746_v6 = vpop.f32.mrb[53].mxu0  ;;  %v1817_v7 = vpop.f32.mrb[47].mxu1  ;;  %v1745_v10 = vadd.f32 %v1744_v3, %v1643_v60  ;;  %v1816_v11 = vadd.f32 %v1815_v4, %v1633_v51 }
 0x933   :  { %v2528_v8 = vpack.c.bf16 %v1837_v2, %v1833_v63  ;;  %v1747_v9 = vadd.f32 %v1746_v6, %v1643_v60  ;;  %v1818_v13 = vadd.f32 %v1817_v7, %v1633_v51 }
 0x934   :  { %v1840_v18 = vmax.f32 %v1745_v10, 0.0  ;;  %v1834_v19 = vmax.f32 %v1816_v11, 0.0 }
 0x935   :  { %v1841_v12 = vmax.f32 %v1747_v9, 0.0  ;;  %v1821_v14 = vpop.f32.mrb[48].mxu1  ;;  %2529 = vmatprep.subr.bf16.mxu0 %v2528_v8  ;;  %v1835_v22 = vmax.f32 %v1818_v13, 0.0 }
 0x936   :  { %v1822_v15 = vadd.f32 %v1821_v14, %v1638_v54  ;;  %v1823_v16 = vpop.f32.mrb[49].mxu1  ;;  %2531 = vmatpush1.bf16.msra.mxu0 %v2530_v5 }
 0x937   :  { %v1824_v17 = vadd.f32 %v1823_v16, %v1638_v54  ;;  %2293 = vmatprep.subr.msk.mxu0 %vm1209_vm6, %v1841_v12 }
 0x938   :  { %v1838_v20 = vmax.f32 %v1822_v15, 0.0 }
 0x939   :  { %v1839_v23 = vmax.f32 %v1824_v17, 0.0  ;;  %v1827_v24 = vpop.f32.mrb[50].mxu1 }
 0x93a   :  { %v2534_v25 = vpack.c.bf16 %v1838_v20, %v1834_v19  ;;  %v1829_v26 = vpop.f32.mrb[51].mxu1  ;;  %2294 = vmatpush1.msk.msra.mxu0 %vm1209_vm6, %v1840_v18  ;;  %v1828_v29 = vadd.f32 %v1827_v24, %v1643_v60 }
 0x93b   :  { %v2532_v27 = vpack.c.bf16 %v1839_v23, %v1835_v22  ;;  %v1830_v28 = vadd.f32 %v1829_v26, %v1643_v60  ;;  %2295 = vmatmul.mubr.msk.f32.vlgmr.msra.gmra.mrb[54].mxu0 %vm1199_vm7, %v2287_v21 }
 0x93c   :  { %1957 = vmatprep.mubr.f32.mxu0 %v2708_v1  ;;  %v1842_v32 = vmax.f32 %v1828_v29, 0.0 }
 0x93d   :  { %v1843_v31 = vmax.f32 %v1830_v28, 0.0  ;;  %2533 = vmatprep.subr.bf16.mxu1 %v2532_v27 }
 0x93e   :  { %2535 = vmatpush1.bf16.msra.mxu1 %v2534_v25 }
 0x93f   :  { %2296 = vmatmul.mubr.msk.f32.gmra.mrb[56].mxu0 %vm1199_vm7, %v2288_v30  ;;  %2298 = vmatprep.subr.msk.mxu1 %vm1209_vm6, %v1843_v31 }
 0x940   :  { %1963 = vmatprep.mubr.f32.mxu0 %v2708_v1 }
 0x942   :  { %2299 = vmatpush1.msk.msra.mxu1 %vm1209_vm6, %v1842_v32 }
 0x943   :  { %2300 = vmatmul.mubr.msk.f32.vlgmr.msra.gmra.mrb[52].mxu1 %vm1199_vm7, %v2287_v21  ;;  %2297 = vmatmul.mubr.msk.f32.gmra.mrb[58].mxu0 %vm1199_vm7, %v2289_v33 }
 0x944   :  { %2038 = vmatprep.mubr.f32.mxu1 %v2708_v1 }
 0x947   :  { %2301 = vmatmul.mubr.msk.f32.gmra.mrb[54].mxu1 %vm1199_vm7, %v2288_v30 }
 0x948   :  { %2044 = vmatprep.mubr.f32.mxu1 %v2708_v1 }
 0x94b   :  { %2302 = vmatmul.mubr.msk.f32.gmra.mrb[56].mxu1 %vm1199_vm7, %v2289_v33 }
 0x94c   :  { %2620 = shalt.err (!%p2617_p12)
}
 0x94d   :  { %s2621_s27 = scalar_lea.hbm %s3259_s8, 128 }
 0x94e   :  { %p2622_p13 = scmp.ne.s32.totalorder %s3259_s8, %s2621_s27  ;;  %p2625_p0 = scmp.lt.u32.totalorder %s2621_s27, %s3259_s8 }
 0x950   :  { %p2627_p1 = pnand %p2625_p0, %p2622_p13 }
 0x952   :  { %2630 = shalt.err (!%p2627_p1)
}
 0x953   :  { %2124 = dma.vmem_to_hbm [thread:$0]  %s2122_s24, 128, %s3259_s8, [#allocation7]  }
 0x954   :  { %s2631_s14 = scalar_lea.vmem %s2112_s25, 128  ;;  %p2636_p3 = scmp.lt.s32.totalorder %s2112_s25, %s2112_s25 }
 0x955   :  { %p2632_p2 = scmp.ne.s32.totalorder %s2112_s25, %s2631_s14  ;;  %p2637_p4 = scmp.lt.s32.totalorder %s2631_s14, %s2631_s14 }
 0x957   :  { %p2638_p5 = por %p2637_p4, %p2636_p3 }
 0x959   :  { %p2639_p6 = pnand %p2638_p5, %p2632_p2 }
 0x95b   :  { %2642 = shalt.err (!%p2639_p6)
}
 0x95c   :  { %s2643_s16 = scalar_lea.hbm %s3258_s7, 128 }
 0x95d   :  { %p2644_p7 = scmp.ne.s32.totalorder %s3258_s7, %s2643_s16  ;;  %p2647_p8 = scmp.lt.u32.totalorder %s2643_s16, %s3258_s7 }
 0x95f   :  { %p2649_p9 = pnand %p2647_p8, %p2644_p7 }
 0x961   :  { %2652 = shalt.err (!%p2649_p9)
}
 0x962   :  { %2114 = dma.vmem_to_hbm [thread:$0]  %s2112_s25, 128, %s3258_s7, [#allocation4]  }
 0x963   :  { %s2712_s21 = smov [#allocation8]  }
 0x964   :  { %s2131_s6 = sshll.u32 %s2712_s21, 4  ;;  %s2132_s6 = int_to_ptr.vmem [resolvable:$true] %s2131_s6 }
 0x965   :  { %s2653_s22 = scalar_lea.vmem %s2132_s6, 512  ;;  %p2658_p11 = scmp.lt.s32.totalorder %s2132_s6, %s2132_s6 }
 0x966   :  { %p2654_p10 = scmp.ne.s32.totalorder %s2132_s6, %s2653_s22  ;;  %p2659_p12 = scmp.lt.s32.totalorder %s2653_s22, %s2653_s22 }
 0x968   :  { %p2660_p13 = por %p2659_p12, %p2658_p11 }
 0x96a   :  { %p2661_p0 = pnand %p2660_p13, %p2654_p10 }
 0x96c   :  { %2664 = shalt.err (!%p2661_p0)
}
 0x96d   :  { %s2665_s24 = scalar_lea.hbm %s3260_s9, 512 }
 0x96e   :  { %p2666_p1 = scmp.ne.s32.totalorder %s3260_s9, %s2665_s24  ;;  %p2669_p2 = scmp.lt.u32.totalorder %s2665_s24, %s3260_s9 }
 0x970   :  { %p2671_p3 = pnand %p2669_p2, %p2666_p1 }
 0x972   :  { %2674 = shalt.err (!%p2671_p3)
}
 0x973   :  { %2134 = dma.vmem_to_hbm [thread:$0]  %s2132_s6, 512, %s3260_s9, [#allocation7]   ;;  %v1855_v1 = vpop.permute.xlu0 %1854  ;;  %v1860_v39 = vpop.permute.xlu1 %1859 }
 0x974   :  { %s2713_s9 = smov [#allocation9]  }
 0x975   :  { %s2140_s27 = sshll.u32 %s2713_s9, 4  ;;  %s2141_s27 = int_to_ptr.vmem [resolvable:$true] %s2140_s27 }
 0x976   :  { %s2675_s28 = scalar_lea.vmem %s2141_s27, 1024  ;;  %p2680_p5 = scmp.lt.s32.totalorder %s2141_s27, %s2141_s27 }
 0x977   :  { %p2676_p4 = scmp.ne.s32.totalorder %s2141_s27, %s2675_s28  ;;  %p2681_p6 = scmp.lt.s32.totalorder %s2675_s28, %s2675_s28 }
 0x979   :  { %p2682_p7 = por %p2681_p6, %p2680_p5 }
 0x97b   :  { %p2683_p8 = pnand %p2682_p7, %p2676_p4 }
 0xa0e   :  { %v1953_v34 = vpop.f32.mrb[54].mxu0 }
 0xa0f   :  { %v1954_v35 = vadd.f32 %v1953_v34, %v1855_v1  ;;  %v1955_v36 = vpop.f32.mrb[55].mxu0 }
 0xa10   :  { %v1956_v37 = vadd.f32 %v1955_v36, %v1855_v1 }
 0xa11   :  { %v2303_v38 = vmul.f32 -1.442695, %v1954_v35 }
 0xa12   :  { %v2304_v40 = vmul.f32 -1.442695, %v1956_v37  ;;  %v1959_v41 = vpop.f32.mrb[56].mxu0 }
 0xa13   :  { %2555 = vpow2.f32 %v2303_v38  ;;  %v1960_v42 = vadd.f32 %v1959_v41, %v1860_v39  ;;  %v1961_v43 = vpop.f32.mrb[57].mxu0 }
 0xa14   :  { %2557 = vpow2.f32 %v2304_v40  ;;  %v1962_v44 = vadd.f32 %v1961_v43, %v1860_v39 }
 0xa15   :  { %v2307_v45 = vmul.f32 -1.442695, %v1960_v42 }
 0xa16   :  { %v2308_v46 = vmul.f32 -1.442695, %v1962_v44  ;;  %v2034_v0 = vpop.f32.mrb[52].mxu1  ;;  %v1965_v47 = vpop.f32.mrb[58].mxu0 }
 0xa17   :  { %2559 = vpow2.f32 %v2307_v45  ;;  %v2035_v48 = vadd.f32 %v2034_v0, %v1855_v1  ;;  %v2036_v49 = vpop.f32.mrb[53].mxu1  ;;  %v1966_v50 = vpop.f32.mrb[59].mxu0 }
 0xa18   :  { %2561 = vpow2.f32 %v2308_v46  ;;  %v2037_v51 = vadd.f32 %v2036_v49, %v1855_v1 }
 0xa19   :  { %v2305_v52 = vmul.f32 -1.442695, %v2035_v48 }
 0xa1a   :  { %v2306_v53 = vmul.f32 -1.442695, %v2037_v51  ;;  %v2040_v54 = vpop.f32.mrb[54].mxu1 }
 0xa1b   :  { %2563 = vpow2.f32 %v2305_v52  ;;  %v2041_v55 = vadd.f32 %v2040_v54, %v1860_v39  ;;  %v2042_v56 = vpop.f32.mrb[55].mxu1 }
 0xa1c   :  { %2565 = vpow2.f32 %v2306_v53  ;;  %v2043_v57 = vadd.f32 %v2042_v56, %v1860_v39 }
 0xa1d   :  { %v2556_v58 = vpop.eup %2555  ;;  %v2309_v59 = vmul.f32 -1.442695, %v2041_v55 }
 0xa1e   :  { %v2558_v60 = vpop.eup %2557  ;;  %v2073_v61 = vadd.f32 1.0, %v2556_v58  ;;  %v2310_v62 = vmul.f32 -1.442695, %v2043_v57  ;;  %v2046_v63 = vpop.f32.mrb[56].mxu1 }
 0xa1f   :  { %v2074_v2 = vadd.f32 1.0, %v2558_v60  ;;  %2567 = vpow2.f32 %v2309_v59  ;;  %v2047_v3 = vpop.f32.mrb[57].mxu1 }
 0xa20   :  { %2569 = vrcp.f32 %v2073_v61 }
 0xa21   :  { %v2560_v4 = vpop.eup %2559  ;;  %2571 = vrcp.f32 %v2074_v2 }
 0xa22   :  { %v2562_v5 = vpop.eup %2561  ;;  %v2077_v6 = vadd.f32 1.0, %v2560_v4  ;;  %2573 = vpow2.f32 %v2310_v62 }
 0xa23   :  { %v2078_v7 = vadd.f32 1.0, %v2562_v5 }
 0xa24   :  { %2575 = vrcp.f32 %v2077_v6 }
 0xa25   :  { %v2564_v8 = vpop.eup %2563  ;;  %2577 = vrcp.f32 %v2078_v7 }
 0xa26   :  { %v2566_v9 = vpop.eup %2565  ;;  %v2075_v10 = vadd.f32 1.0, %v2564_v8 }
 0xa27   :  { %v2076_v11 = vadd.f32 1.0, %v2566_v9 }
 0xa28   :  { %2579 = vrcp.f32 %v2075_v10 }
 0xa29   :  { %v2568_v12 = vpop.eup %2567  ;;  %2581 = vrcp.f32 %v2076_v11 }
 0xa2a   :  { %v2570_v13 = vpop.eup %2569  ;;  %v2079_v14 = vadd.f32 1.0, %v2568_v12 }
 0xa2b   :  { %v2572_v15 = vpop.eup %2571  ;;  %2097 = vst [vmem:[#allocation9] sm:$0xff] %v2570_v13 }
 0xa2c   :  { %v2574_v16 = vpop.eup %2573  ;;  %2098 = vst [vmem:[#allocation9 + $0x8] sm:$0xff] %v2572_v15  ;;  %2583 = vrcp.f32 %v2079_v14 }
 0xa2d   :  { %v2080_v17 = vadd.f32 1.0, %v2574_v16 }
 0xa2e   :  { %v2576_v18 = vpop.eup %2575 }
 0xa2f   :  { %v2578_v19 = vpop.eup %2577  ;;  %2101 = vst [vmem:[#allocation9 + $0x20] sm:$0xff] %v2576_v18  ;;  %2585 = vrcp.f32 %v2080_v17 }
 0xa30   :  { %2102 = vst [vmem:[#allocation9 + $0x28] sm:$0xff] %v2578_v19 }
 0xa32   :  { %v2580_v20 = vpop.eup %2579 }
 0xa33   :  { %v2582_v21 = vpop.eup %2581  ;;  %2099 = vst [vmem:[#allocation9 + $0x10] sm:$0xff] %v2580_v20 }
 0xa34   :  { %2100 = vst [vmem:[#allocation9 + $0x18] sm:$0xff] %v2582_v21 }
 0xa36   :  { %v2584_v22 = vpop.eup %2583 }
 0xa37   :  { %2103 = vst [vmem:[#allocation9 + $0x30] sm:$0xff] %v2584_v22 }
 0xa39   :  { %v2586_v23 = vpop.eup %2585 }
 0xa3a   :  { %2104 = vst [vmem:[#allocation9 + $0x38] sm:$0xff] %v2586_v23 }
 0xa3b   :  { %2686 = shalt.err (!%p2683_p8)
}
 0xa3c   :  { %s2687_s11 = scalar_lea.hbm %s3261_s10, 1024 }
 0xa3d   :  { %p2688_p9 = scmp.ne.s32.totalorder %s3261_s10, %s2687_s11  ;;  %p2691_p10 = scmp.lt.u32.totalorder %s2687_s11, %s3261_s10 }
 0xa3f   :  { %p2693_p11 = pnand %p2691_p10, %p2688_p9 }
 0xa41   :  { %2696 = shalt.err (!%p2693_p11)
}
 0xa42   :  { %s2714_s0 = smov 512   ;;  %s2715_s16 = smov 32  }
 0xa43   :  { %2146 = dma.vmem_to_hbm [thread:$0]  %s2141_s27, 1024, %s3261_s10, [#allocation10], %s2714_s0, %s2714_s0, %s2715_s16  }
 0xa44   :  { %2699 = dma.done.wait [#allocation4], 128  }
 0xa45   :  { %2700 = vsyncadd [#allocation4], 4294967168 }
 0xa46   :  { %2701 = dma.done.wait [#allocation7], 640  }
 0xa47   :  { %2702 = vsyncadd [#allocation7], 4294966656 }
 0xa48   :  { %2703 = dma.done.wait [#allocation10], 1024  }
 0xa49   :  { %2704 = vsyncadd [#allocation10], 4294966272 }
 0xa4a   :  { %2159 = vsyncpa [#allocation3], 1 }
 0xa4b   :  { %2160 = vsyncpa [#allocation4], 1 }
 0xa4c   :  { %2161 = vsyncpa [#allocation7], 1 }
 0xa4d   :  { %2162 = vsyncpa [#allocation10], 1 }

</bundles_post_ra>
